<compile_context>
chip_gen: v5e
topology: v5e:2x2
jax: 0.10.0
libtpu: 0.0.40
codegen_flags: <defaults>
</compile_context>

<pallas_src>
import functools

import jax
import jax.numpy as jnp
from jax.experimental import pallas as pl
from jax.experimental.pallas import tpu as pltpu


def _round_up(x, m):
    return -(-x // m) * m


def _pick_tile(dim, cap, mult):
    """Largest t <= cap with t % mult == 0 and dim % t == 0 (None if none)."""
    best = None
    t = mult
    lim = min(cap, dim)
    while t <= lim:
        if dim % t == 0:
            best = t
        t += mult
    return best


# --------------------------------------------------------------------------
# Gridded fused matmul kernel: o = act((x @ w) * scale + shift)
# --------------------------------------------------------------------------
def _fused_matmul_kernel(x_ref, w_ref, scale_ref, shift_ref, o_ref, acc_ref,
                         *, act):
    k = pl.program_id(2)

    @pl.when(k == 0)
    def _():
        acc_ref[...] = jnp.zeros_like(acc_ref)

    acc_ref[...] += jnp.dot(x_ref[...], w_ref[...],
                            preferred_element_type=jnp.float32)

    @pl.when(k == pl.num_programs(2) - 1)
    def _():
        y = acc_ref[...] * scale_ref[...] + shift_ref[...]
        if act == "relu":
            y = jnp.maximum(y, 0.0)
        elif act == "tanh":
            y = jnp.tanh(y)
        o_ref[...] = y.astype(o_ref.dtype)


def fused_matmul(x, w, scale, shift, act="none", out_dtype=jnp.bfloat16):
    """x:(M,K) w:(K,N) scale/shift:(1,N) -> (M,N). bf16 operands, f32 accum.

    No HBM padding of the activation: tiles are exact divisors (multiples of
    8 / 128) or the full dim, which is always a legal block shape.
    """
    M, K = x.shape
    Kw, N = w.shape
    assert Kw == K, (Kw, K)
    x = x.astype(jnp.bfloat16)
    w = w.astype(jnp.bfloat16)

    tm = _pick_tile(M, 512, 8) or M
    tn = _pick_tile(N, 512, 128) or N
    tk = _pick_tile(K, 1024, 128) or K
    grid = (M // tm, N // tn, K // tk)

    out = pl.pallas_call(
        functools.partial(_fused_matmul_kernel, act=act),
        out_shape=jax.ShapeDtypeStruct((M, N), out_dtype),
        grid_spec=pltpu.PrefetchScalarGridSpec(
            num_scalar_prefetch=0,
            grid=grid,
            in_specs=[
                pl.BlockSpec((tm, tk), lambda i, j, k: (i, k)),
                pl.BlockSpec((tk, tn), lambda i, j, k: (k, j)),
                pl.BlockSpec((1, tn), lambda i, j, k: (0, j)),
                pl.BlockSpec((1, tn), lambda i, j, k: (0, j)),
            ],
            out_specs=pl.BlockSpec((tm, tn), lambda i, j, k: (i, j)),
            scratch_shapes=[pltpu.VMEM((tm, tn), jnp.float32)],
        ),
        compiler_params=pltpu.CompilerParams(
            dimension_semantics=("parallel", "parallel", "arbitrary"),
            vmem_limit_bytes=48 * 1024 * 1024,   # within v7x's 64 MiB VMEM
        ),
        cost_estimate=pl.CostEstimate(
            flops=2 * M * N * K,
            transcendentals=M * N if act == "tanh" else 0,
            bytes_accessed=int(M * K * 2 * (N // tn) + K * N * 2 * (M // tm)
                               + M * N * jnp.dtype(out_dtype).itemsize),
        ),
    )(x, w, scale, shift)
    return out


# --------------------------------------------------------------------------
# Quantizer kernel with fused 1x1 pre/post quant convs.
#   h -> z = h @ Wpre + bpre -> nearest codebook -> z_q
#     -> out = z_q @ Wpost * s + t ; per-program SSE partials for the loss.
# --------------------------------------------------------------------------
def _quantize_kernel(h_ref, wpre_ref, bpre_ref, cb_ref, e2_ref,
                     wpost_ref, spost_ref, tpost_ref,
                     out_ref, idx_ref, loss_ref, *, m_valid, k_pad):
    i = pl.program_id(0)
    tm = h_ref.shape[0]

    # pre_quant 1x1 conv (bf16 x bf16 -> f32)
    z = jnp.dot(h_ref[...], wpre_ref[...], preferred_element_type=jnp.float32)
    z = z + bpre_ref[...]

    # argmin_k ||z - e_k||^2 == argmin_k (||e_k||^2 - 2 z.e_k)
    zb = z.astype(jnp.bfloat16)
    ze = jax.lax.dot_general(zb, cb_ref[...], (((1,), (1,)), ((), ())),
                             preferred_element_type=jnp.float32)      # (tm, K)
    d = e2_ref[...] - 2.0 * ze                                        # (tm, K)
    min_d = jnp.min(d, axis=1, keepdims=True)
    col = jax.lax.broadcasted_iota(jnp.int32, d.shape, 1)
    idx = jnp.min(jnp.where(d <= min_d, col, k_pad), axis=1, keepdims=True)
    onehot = (col == idx).astype(jnp.bfloat16)
    zq = jnp.dot(onehot, cb_ref[...], preferred_element_type=jnp.float32)

    # lane-dense index store: unmasked (tm, 128) block, column 0 read outside.
    idx_ref[0] = jnp.broadcast_to(idx, idx_ref.shape[1:])

    # per-program commitment-loss partial SSE (masked in case of row padding);
    # own output block per program -> grid axis stays "parallel".
    row = i * tm + jax.lax.broadcasted_iota(jnp.int32, (tm, 1), 0)
    valid = (row < m_valid).astype(jnp.float32)
    diff = (zq - z) * valid
    sse = jnp.sum(jnp.sum(diff * diff, axis=1, keepdims=True),
                  axis=0, keepdims=True)                              # (1, 1)
    loss_ref[0] = jnp.broadcast_to(sse, loss_ref.shape[1:])

    # post_quant 1x1 conv
    y = jnp.dot(zq.astype(jnp.bfloat16), wpost_ref[...],
                preferred_element_type=jnp.float32)
    y = y * spost_ref[...] + tpost_ref[...]
    out_ref[...] = y.astype(out_ref.dtype)


def quantize_fused(h_flat, qp, beta):
    """h_flat:(M,Ce) -> (post-quant (M,Cp), indices (M,), commitment loss)."""
    M, Ce = h_flat.shape
    Kp, Dp = qp["cb"].shape
    Cp = qp["wpost"].shape[1]

    tm = _pick_tile(M, 256, 8) or M
    grid_m = M // tm

    out, idx, lossp = pl.pallas_call(
        functools.partial(_quantize_kernel, m_valid=M, k_pad=Kp),
        out_shape=(jax.ShapeDtypeStruct((M, Cp), jnp.bfloat16),
                   jax.ShapeDtypeStruct((grid_m, tm, 128), jnp.int32),
                   jax.ShapeDtypeStruct((grid_m, 8, 128), jnp.float32)),
        grid_spec=pltpu.PrefetchScalarGridSpec(
            num_scalar_prefetch=0,
            grid=(grid_m,),
            in_specs=[
                pl.BlockSpec((tm, Ce), lambda i: (i, 0)),
                pl.BlockSpec((Ce, Dp), lambda i: (0, 0)),
                pl.BlockSpec((1, Dp), lambda i: (0, 0)),
                pl.BlockSpec((Kp, Dp), lambda i: (0, 0)),
                pl.BlockSpec((1, Kp), lambda i: (0, 0)),
                pl.BlockSpec((Dp, Cp), lambda i: (0, 0)),
                pl.BlockSpec((1, Cp), lambda i: (0, 0)),
                pl.BlockSpec((1, Cp), lambda i: (0, 0)),
            ],
            out_specs=(pl.BlockSpec((tm, Cp), lambda i: (i, 0)),
                       pl.BlockSpec((1, tm, 128), lambda i: (i, 0, 0)),
                       pl.BlockSpec((1, 8, 128), lambda i: (i, 0, 0))),
        ),
        compiler_params=pltpu.CompilerParams(
            dimension_semantics=("parallel",),
            vmem_limit_bytes=48 * 1024 * 1024,
        ),
    )(h_flat, qp["wpre"], qp["bpre"], qp["cb"], qp["e2"],
      qp["wpost"], qp["spost"], qp["tpost"])

    sse = jnp.sum(lossp[:, 0, 0])
    # forward value of mse(zq, sg(z)) + beta * mse(sg(zq), z)
    loss = (1.0 + beta) * sse / (M * qp["latent_dim"])
    indices = idx[:, :, 0].reshape(M)
    return out, indices, loss


# --------------------------------------------------------------------------
# Conv glue (im2col + phase-decomposed transposed conv) on top of fused_matmul
# --------------------------------------------------------------------------
def _im2col(x, kh, kw, stride, pad):
    # TODO(synk): move this into the matmul kernel (windowed in-kernel reads)
    # to avoid materializing the kh*kw-inflated patch matrix in HBM.
    if pad:
        x = jnp.pad(x, ((0, 0), (pad, pad), (pad, pad), (0, 0)))
    B, H, W, C = x.shape
    oh = (H - kh) // stride + 1
    ow = (W - kw) // stride + 1
    cols = []
    for i in range(kh):
        for j in range(kw):
            cols.append(x[:, i:i + oh * stride:stride,
                          j:j + ow * stride:stride, :])
    cols = jnp.concatenate(cols, axis=-1)            # (B, oh, ow, kh*kw*C)
    return cols.reshape(B * oh * ow, kh * kw * C), (B, oh, ow)


def conv2d(x, wmat, scale, shift, act="relu", out_dtype=jnp.bfloat16):
    """Conv2d(k=4, s=2, p=1) on NHWC with a pre-packed (16*Cin, Cout) weight."""
    cout = wmat.shape[1]
    cols, (B, oh, ow) = _im2col(x, 4, 4, 2, 1)
    y = fused_matmul(cols, wmat, scale, shift, act, out_dtype)
    return y.reshape(B, oh, ow, cout)


def conv_transpose2d(x, wmat4, scale4, shift4, act, out_dtype=jnp.bfloat16):
    """ConvTranspose2d(k=4, s=2, p=1) on NHWC.

    Decomposed into 4 output phases sharing ONE 3x3/stride-1 im2col of the
    (pad=1) input; the 4 phase weights are pre-packed into one (9*Cin, 4*Cout)
    matrix -> a single dense matmul, no zero-dilated input.
    """
    cout = wmat4.shape[1] // 4
    B, H, W, _ = x.shape
    cols, _ = _im2col(x, 3, 3, 1, 1)                         # (B*H*W, 9*Cin)
    y = fused_matmul(cols, wmat4, scale4, shift4, act, out_dtype)
    # TODO(synk): interleave the 4 phases from the kernel's output index_map
    # instead of this extra full-tensor transpose copy.
    y = y.reshape(B, H, W, 2, 2, cout)
    y = jnp.transpose(y, (0, 1, 3, 2, 4, 5)).reshape(B, 2 * H, 2 * W, cout)
    return y


# --------------------------------------------------------------------------
# One-time parameter preparation (hoisted out of the jitted forward)
# --------------------------------------------------------------------------
def _fold_bn(bias, bn=None, eps=1e-5):
    """Fold conv bias (+ eval-mode BatchNorm) into per-channel scale/shift."""
    if bn is None:
        return jnp.ones_like(bias), bias
    s = bn["gamma"] / jnp.sqrt(bn["var"] + eps)
    return s, (bias - bn["mean"]) * s + bn["beta"]


# output-phase parity -> {3x3 window position: 4x4 kernel index}
_TAP = {0: {0: 3, 1: 1}, 1: {1: 2, 2: 0}}


def _pack_conv_weight(w_oihw):
    cout, cin, kh, kw = w_oihw.shape
    return (jnp.transpose(w_oihw, (2, 3, 1, 0))
            .reshape(kh * kw * cin, cout).astype(jnp.bfloat16))


def _pack_deconv_weight(w_iohw):
    cin, cout, _, _ = w_iohw.shape          # valid for k=4, s=2, p=1 only
    wc = jnp.zeros((3, 3, cin, 4 * cout), jnp.float32)
    for py in (0, 1):
        for px in (0, 1):
            p = py * 2 + px
            for tr, ki in _TAP[py].items():
                for tc, kj in _TAP[px].items():
                    wc = wc.at[tr, tc, :, p * cout:(p + 1) * cout].set(
                        w_iohw[:, :, ki, kj].astype(jnp.float32))
    return wc.reshape(9 * cin, 4 * cout).astype(jnp.bfloat16)


def prepare_params(params, eps=1e-5):
    """Pack / pad / cast all weights once so the forward is pure activations."""
    prepped = {"encoder": [], "decoder": []}

    for layer in params["encoder"]:
        s, t = _fold_bn(layer["b"], layer["bn"], eps)
        prepped["encoder"].append({
            "w": _pack_conv_weight(layer["w"]),
            "scale": s.astype(jnp.float32)[None, :],
            "shift": t.astype(jnp.float32)[None, :],
        })

    codebook = params["codebook"].astype(jnp.float32)
    K, D = codebook.shape
    Cp = params["post_quant"]["w"].shape[0]
    Dp, Kp = _round_up(D, 128), _round_up(K, 128)

    wpre = params["pre_quant"]["w"][:, :, 0, 0].T.astype(jnp.float32)   # (Ce,D)
    wpost = params["post_quant"]["w"][:, :, 0, 0].T.astype(jnp.float32)  # (D,Cp)
    cb_bf16 = jnp.pad(codebook, ((0, Kp - K), (0, Dp - D))).astype(jnp.bfloat16)
    e2 = jnp.sum(cb_bf16[:K, :].astype(jnp.float32) ** 2, axis=1)
    # padded codebook rows get huge squared norm so they never win the argmin
    e2 = jnp.pad(e2[None, :], ((0, 0), (0, Kp - K)), constant_values=1e30)

    prepped["quant"] = {
        "wpre": jnp.pad(wpre, ((0, 0), (0, Dp - D))).astype(jnp.bfloat16),
        "bpre": jnp.pad(params["pre_quant"]["b"].astype(jnp.float32)[None, :],
                        ((0, 0), (0, Dp - D))),
        "cb": cb_bf16,
        "e2": e2,
        "wpost": jnp.pad(wpost, ((0, Dp - D), (0, 0))).astype(jnp.bfloat16),
        "spost": jnp.ones((1, Cp), jnp.float32),
        "tpost": params["post_quant"]["b"].astype(jnp.float32)[None, :],
        "latent_dim": D,
    }

    n_dec = len(params["decoder"])
    for li, layer in enumerate(params["decoder"]):
        last = (li == n_dec - 1)
        s, t = _fold_bn(layer["b"], None if last else layer["bn"], eps)
        prepped["decoder"].append({
            "w": _pack_deconv_weight(layer["w"]),
            "scale": jnp.tile(s.astype(jnp.float32), 4)[None, :],
            "shift": jnp.tile(t.astype(jnp.float32), 4)[None, :],
        })
    return prepped


# --------------------------------------------------------------------------
# VQVAE forward
# --------------------------------------------------------------------------
def vqvae_forward(prepped, x_nchw, beta=0.25):
    h = jnp.transpose(x_nchw, (0, 2, 3, 1)).astype(jnp.bfloat16)   # -> NHWC

    # Encoder
    for layer in prepped["encoder"]:
        h = conv2d(h, layer["w"], layer["scale"], layer["shift"],
                   act="relu", out_dtype=jnp.bfloat16)

    B, H, W, Ce = h.shape

    # pre_quant (1x1) + quantizer + post_quant (1x1), fused in one kernel
    zq_post, idx_flat, commitment_loss = quantize_fused(
        h.reshape(B * H * W, Ce), prepped["quant"], beta)
    encoding_indices = idx_flat.reshape(B, H, W)
    h = zq_post.reshape(B, H, W, -1)

    # Decoder (phase-decomposed transposed convs)
    n_dec = len(prepped["decoder"])
    for li, layer in enumerate(prepped["decoder"]):
        last = (li == n_dec - 1)
        h = conv_transpose2d(h, layer["w"], layer["scale"], layer["shift"],
                             act="tanh" if last else "relu",
                             out_dtype=jnp.float32 if last else jnp.bfloat16)

    x_recon = jnp.transpose(h, (0, 3, 1, 2)).astype(jnp.float32)   # -> NCHW
    return x_recon, commitment_loss, encoding_indices


# --------------------------------------------------------------------------
# Deterministic parameter init (synthetic weights, no checkpoint)
# --------------------------------------------------------------------------
def init_params(key, convbn_channels, transposebn_channels,
                latent_dim, num_embeddings):
    keys = iter(jax.random.split(key, 64))

    def nrm(shape, scale=0.1):
        return scale * jax.random.normal(next(keys), shape, jnp.float32)

    def bn_params(c):
        return {"gamma": 1.0 + nrm((c,)), "beta": nrm((c,)),
                "mean": nrm((c,)), "var": 1.0 + jnp.abs(nrm((c,)))}

    params = {"encoder": [], "decoder": []}
    for cin, cout in zip(convbn_channels[:-1], convbn_channels[1:]):
        params["encoder"].append(
            {"w": nrm((cout, cin, 4, 4)), "b": nrm((cout,)),
             "bn": bn_params(cout)})
    params["pre_quant"] = {"w": nrm((latent_dim, convbn_channels[-1], 1, 1)),
                           "b": nrm((latent_dim,))}
    params["codebook"] = nrm((num_embeddings, latent_dim), scale=1.0)
    params["post_quant"] = {"w": nrm((transposebn_channels[0], latent_dim, 1, 1)),
                            "b": nrm((transposebn_channels[0],))}
    for cin, cout in zip(transposebn_channels[:-1], transposebn_channels[1:]):
        params["decoder"].append(
            {"w": nrm((cin, cout, 4, 4)),   # ConvTranspose2d weight layout
             "b": nrm((cout,)), "bn": bn_params(cout)})
    return params


if __name__ == "__main__":
    key = jax.random.PRNGKey(0)
    pkey, xkey = jax.random.split(key)

    convbn_channels = [3, 16, 32]         # encoder: 3 -> 16 -> 32 (16x16 -> 4x4)
    transposebn_channels = [32, 16, 3]    # decoder: 32 -> 16 -> 3 (4x4 -> 16x16)
    latent_dim = 8
    num_embeddings = 16

    params = init_params(pkey, convbn_channels, transposebn_channels,
                         latent_dim, num_embeddings)
    # one-time weight packing / padding / BN folding (hoisted out of forward)
    prepped = prepare_params(params)
    x = jax.random.normal(xkey, (2, 3, 16, 16), jnp.float32)

    fwd = jax.jit(vqvae_forward)
    x_recon, commitment_loss, encoding_indices = fwd(prepped, x)
    jax.block_until_ready((x_recon, commitment_loss, encoding_indices))

    assert x_recon.shape == (2, 3, 16, 16)
    assert encoding_indices.shape == (2, 4, 4)
    assert commitment_loss.shape == ()
    assert bool(jnp.isfinite(commitment_loss))
    assert bool(jnp.all(encoding_indices >= 0)) and \
        bool(jnp.all(encoding_indices < num_embeddings))
    print("KERNEL_OK")
</pallas_src>

<mosaic_0001>
module attributes {stable_mosaic.version = 11 : i64} {
  func.func @_fused_matmul_kernel(%arg0: i32, %arg1: i32, %arg2: i32, %arg3: memref<128x48xbf16, #tpu.memory_space<vmem>>, %arg4: memref<48x16xbf16, #tpu.memory_space<vmem>>, %arg5: memref<1x16xf32, #tpu.memory_space<vmem>>, %arg6: memref<1x16xf32, #tpu.memory_space<vmem>>, %arg7: memref<128x16xbf16, #tpu.memory_space<vmem>>, %arg8: memref<128x16xf32, #tpu.memory_space<vmem>>) attributes {dimension_semantics = [#tpu.dimension_semantics<parallel>, #tpu.dimension_semantics<parallel>, #tpu.dimension_semantics<arbitrary>], iteration_bounds = array<i64: 1, 1, 1>, scalar_prefetch = 0 : i64, scratch_operands = 1 : i64, tpu.core_type = #tpu.core_type<tc>, window_params = [{transform_indices = @transform_0, window_bounds = array<i64: 128, 48>}, {transform_indices = @transform_1, window_bounds = array<i64: 48, 16>}, {transform_indices = @transform_2, window_bounds = array<i64: 1, 16>}, {transform_indices = @transform_3, window_bounds = array<i64: 1, 16>}, {transform_indices = @transform_4, window_bounds = array<i64: 128, 16>}]} {
    %c0_i32 = arith.constant 0 : i32
    %0 = arith.cmpi eq, %arg2, %c0_i32 : i32
    %1 = arith.extui %0 : i1 to i32
    %c0_i32_0 = arith.constant 0 : i32
    %2 = arith.cmpi ne, %1, %c0_i32_0 : i32
    scf.if %2 {
      %cst_10 = arith.constant 0.000000e+00 : f32
      %12 = vector.broadcast %cst_10 : f32 to vector<128x16xf32>
      %c0_11 = arith.constant 0 : index
      %c0_12 = arith.constant 0 : index
      %13 = vector.load %arg8[%c0_11, %c0_12] : memref<128x16xf32, #tpu.memory_space<vmem>>, vector<128x16xf32>
      tpu.vector_store %arg8[%c0_11, %c0_12], %12 {strides = array<i32>} : memref<128x16xf32, #tpu.memory_space<vmem>>, vector<128x16xf32>,
    } else {
    }
    %c0 = arith.constant 0 : index
    %c0_1 = arith.constant 0 : index
    %3 = vector.load %arg8[%c0, %c0_1] : memref<128x16xf32, #tpu.memory_space<vmem>>, vector<128x16xf32>
    %c0_2 = arith.constant 0 : index
    %c0_3 = arith.constant 0 : index
    %4 = vector.load %arg3[%c0_2, %c0_3] : memref<128x48xbf16, #tpu.memory_space<vmem>>, vector<128x48xbf16>
    %c0_4 = arith.constant 0 : index
    %c0_5 = arith.constant 0 : index
    %5 = vector.load %arg4[%c0_4, %c0_5] : memref<48x16xbf16, #tpu.memory_space<vmem>>, vector<48x16xbf16>
    %cst = arith.constant dense<0.000000e+00> : vector<128x16xf32>
    %6 = tpu.matmul %4, %5, %cst {dimension_numbers = #tpu.dot_dimension_numbers<[1], [0], [0], [1], [0, 0, 1, 1], [], []>} : vector<128x48xbf16>, vector<48x16xbf16>, vector<128x16xf32> -> vector<128x16xf32>
    %7 = arith.addf %3, %6 : vector<128x16xf32>
    %c0_6 = arith.constant 0 : index
    %c0_7 = arith.constant 0 : index
    %8 = vector.load %arg8[%c0_6, %c0_7] : memref<128x16xf32, #tpu.memory_space<vmem>>, vector<128x16xf32>
    tpu.vector_store %arg8[%c0_6, %c0_7], %7 {strides = array<i32>} : memref<128x16xf32, #tpu.memory_space<vmem>>, vector<128x16xf32>,
    %c0_i32_8 = arith.constant 0 : i32
    %9 = arith.cmpi eq, %arg2, %c0_i32_8 : i32
    %10 = arith.extui %9 : i1 to i32
    %c0_i32_9 = arith.constant 0 : i32
    %11 = arith.cmpi ne, %10, %c0_i32_9 : i32
    scf.if %11 {
      %c0_10 = arith.constant 0 : index
      %c0_11 = arith.constant 0 : index
      %12 = vector.load %arg8[%c0_10, %c0_11] : memref<128x16xf32, #tpu.memory_space<vmem>>, vector<128x16xf32>
      %c0_12 = arith.constant 0 : index
      %c0_13 = arith.constant 0 : index
      %13 = vector.load %arg5[%c0_12, %c0_13] : memref<1x16xf32, #tpu.memory_space<vmem>>, vector<1x16xf32>
      %14 = vector.broadcast %13 : vector<1x16xf32> to vector<128x16xf32>
      %15 = arith.mulf %12, %14 : vector<128x16xf32>
      %c0_14 = arith.constant 0 : index
      %c0_15 = arith.constant 0 : index
      %16 = vector.load %arg6[%c0_14, %c0_15] : memref<1x16xf32, #tpu.memory_space<vmem>>, vector<1x16xf32>
      %17 = vector.broadcast %16 : vector<1x16xf32> to vector<128x16xf32>
      %18 = arith.addf %15, %17 : vector<128x16xf32>
      %cst_16 = arith.constant 0.000000e+00 : f32
      %19 = vector.broadcast %cst_16 : f32 to vector<128x16xf32>
      %20 = arith.maximumf %18, %19 : vector<128x16xf32>
      %21 = arith.truncf %20 : vector<128x16xf32> to vector<128x16xbf16>
      %c0_17 = arith.constant 0 : index
      %c0_18 = arith.constant 0 : index
      %22 = vector.load %arg7[%c0_17, %c0_18] : memref<128x16xbf16, #tpu.memory_space<vmem>>, vector<128x16xbf16>
      tpu.vector_store %arg7[%c0_17, %c0_18], %21 {strides = array<i32>} : memref<128x16xbf16, #tpu.memory_space<vmem>>, vector<128x16xbf16>,
    } else {
    }
    return
  }
  func.func @transform_0(%arg0: i32, %arg1: i32, %arg2: i32) -> (i32, i32) {
    %c0_i32 = arith.constant 0 : i32
    return %arg0, %arg2 : i32, i32
  }
  func.func @transform_1(%arg0: i32, %arg1: i32, %arg2: i32) -> (i32, i32) {
    %c0_i32 = arith.constant 0 : i32
    return %arg2, %arg1 : i32, i32
  }
  func.func @transform_2(%arg0: i32, %arg1: i32, %arg2: i32) -> (i32, i32) {
    %c0_i32 = arith.constant 0 : i32
    %c0_i32_0 = arith.constant 0 : i32
    return %c0_i32, %arg1 : i32, i32
  }
  func.func @transform_3(%arg0: i32, %arg1: i32, %arg2: i32) -> (i32, i32) {
    %c0_i32 = arith.constant 0 : i32
    %c0_i32_0 = arith.constant 0 : i32
    return %c0_i32, %arg1 : i32, i32
  }
  func.func @transform_4(%arg0: i32, %arg1: i32, %arg2: i32) -> (i32, i32) {
    %c0_i32 = arith.constant 0 : i32
    return %arg0, %arg1 : i32, i32
  }
}

module attributes {stable_mosaic.version = 11 : i64} {
  func.func @_fused_matmul_kernel(%arg0: i32, %arg1: i32, %arg2: i32, %arg3: memref<32x256xbf16, #tpu.memory_space<vmem>>, %arg4: memref<256x32xbf16, #tpu.memory_space<vmem>>, %arg5: memref<1x32xf32, #tpu.memory_space<vmem>>, %arg6: memref<1x32xf32, #tpu.memory_space<vmem>>, %arg7: memref<32x32xbf16, #tpu.memory_space<vmem>>, %arg8: memref<32x32xf32, #tpu.memory_space<vmem>>) attributes {dimension_semantics = [#tpu.dimension_semantics<parallel>, #tpu.dimension_semantics<parallel>, #tpu.dimension_semantics<arbitrary>], iteration_bounds = array<i64: 1, 1, 1>, scalar_prefetch = 0 : i64, scratch_operands = 1 : i64, tpu.core_type = #tpu.core_type<tc>, window_params = [{transform_indices = @transform_0, window_bounds = array<i64: 32, 256>}, {transform_indices = @transform_1, window_bounds = array<i64: 256, 32>}, {transform_indices = @transform_2, window_bounds = array<i64: 1, 32>}, {transform_indices = @transform_3, window_bounds = array<i64: 1, 32>}, {transform_indices = @transform_4, window_bounds = array<i64: 32, 32>}]} {
    %c0_i32 = arith.constant 0 : i32
    %0 = arith.cmpi eq, %arg2, %c0_i32 : i32
    %1 = arith.extui %0 : i1 to i32
    %c0_i32_0 = arith.constant 0 : i32
    %2 = arith.cmpi ne, %1, %c0_i32_0 : i32
    scf.if %2 {
      %cst_10 = arith.constant 0.000000e+00 : f32
      %12 = vector.broadcast %cst_10 : f32 to vector<32x32xf32>
      %c0_11 = arith.constant 0 : index
      %c0_12 = arith.constant 0 : index
      %13 = vector.load %arg8[%c0_11, %c0_12] : memref<32x32xf32, #tpu.memory_space<vmem>>, vector<32x32xf32>
      tpu.vector_store %arg8[%c0_11, %c0_12], %12 {strides = array<i32>} : memref<32x32xf32, #tpu.memory_space<vmem>>, vector<32x32xf32>,
    } else {
    }
    %c0 = arith.constant 0 : index
    %c0_1 = arith.constant 0 : index
    %3 = vector.load %arg8[%c0, %c0_1] : memref<32x32xf32, #tpu.memory_space<vmem>>, vector<32x32xf32>
    %c0_2 = arith.constant 0 : index
    %c0_3 = arith.constant 0 : index
    %4 = vector.load %arg3[%c0_2, %c0_3] : memref<32x256xbf16, #tpu.memory_space<vmem>>, vector<32x256xbf16>
    %c0_4 = arith.constant 0 : index
    %c0_5 = arith.constant 0 : index
    %5 = vector.load %arg4[%c0_4, %c0_5] : memref<256x32xbf16, #tpu.memory_space<vmem>>, vector<256x32xbf16>
    %cst = arith.constant dense<0.000000e+00> : vector<32x32xf32>
    %6 = tpu.matmul %4, %5, %cst {dimension_numbers = #tpu.dot_dimension_numbers<[1], [0], [0], [1], [0, 0, 1, 1], [], []>} : vector<32x256xbf16>, vector<256x32xbf16>, vector<32x32xf32> -> vector<32x32xf32>
    %7 = arith.addf %3, %6 : vector<32x32xf32>
    %c0_6 = arith.constant 0 : index
    %c0_7 = arith.constant 0 : index
    %8 = vector.load %arg8[%c0_6, %c0_7] : memref<32x32xf32, #tpu.memory_space<vmem>>, vector<32x32xf32>
    tpu.vector_store %arg8[%c0_6, %c0_7], %7 {strides = array<i32>} : memref<32x32xf32, #tpu.memory_space<vmem>>, vector<32x32xf32>,
    %c0_i32_8 = arith.constant 0 : i32
    %9 = arith.cmpi eq, %arg2, %c0_i32_8 : i32
    %10 = arith.extui %9 : i1 to i32
    %c0_i32_9 = arith.constant 0 : i32
    %11 = arith.cmpi ne, %10, %c0_i32_9 : i32
    scf.if %11 {
      %c0_10 = arith.constant 0 : index
      %c0_11 = arith.constant 0 : index
      %12 = vector.load %arg8[%c0_10, %c0_11] : memref<32x32xf32, #tpu.memory_space<vmem>>, vector<32x32xf32>
      %c0_12 = arith.constant 0 : index
      %c0_13 = arith.constant 0 : index
      %13 = vector.load %arg5[%c0_12, %c0_13] : memref<1x32xf32, #tpu.memory_space<vmem>>, vector<1x32xf32>
      %14 = vector.broadcast %13 : vector<1x32xf32> to vector<32x32xf32>
      %15 = arith.mulf %12, %14 : vector<32x32xf32>
      %c0_14 = arith.constant 0 : index
      %c0_15 = arith.constant 0 : index
      %16 = vector.load %arg6[%c0_14, %c0_15] : memref<1x32xf32, #tpu.memory_space<vmem>>, vector<1x32xf32>
      %17 = vector.broadcast %16 : vector<1x32xf32> to vector<32x32xf32>
      %18 = arith.addf %15, %17 : vector<32x32xf32>
      %cst_16 = arith.constant 0.000000e+00 : f32
      %19 = vector.broadcast %cst_16 : f32 to vector<32x32xf32>
      %20 = arith.maximumf %18, %19 : vector<32x32xf32>
      %21 = arith.truncf %20 : vector<32x32xf32> to vector<32x32xbf16>
      %c0_17 = arith.constant 0 : index
      %c0_18 = arith.constant 0 : index
      %22 = vector.load %arg7[%c0_17, %c0_18] : memref<32x32xbf16, #tpu.memory_space<vmem>>, vector<32x32xbf16>
      tpu.vector_store %arg7[%c0_17, %c0_18], %21 {strides = array<i32>} : memref<32x32xbf16, #tpu.memory_space<vmem>>, vector<32x32xbf16>,
    } else {
    }
    return
  }
  func.func @transform_0(%arg0: i32, %arg1: i32, %arg2: i32) -> (i32, i32) {
    %c0_i32 = arith.constant 0 : i32
    return %arg0, %arg2 : i32, i32
  }
  func.func @transform_1(%arg0: i32, %arg1: i32, %arg2: i32) -> (i32, i32) {
    %c0_i32 = arith.constant 0 : i32
    return %arg2, %arg1 : i32, i32
  }
  func.func @transform_2(%arg0: i32, %arg1: i32, %arg2: i32) -> (i32, i32) {
    %c0_i32 = arith.constant 0 : i32
    %c0_i32_0 = arith.constant 0 : i32
    return %c0_i32, %arg1 : i32, i32
  }
  func.func @transform_3(%arg0: i32, %arg1: i32, %arg2: i32) -> (i32, i32) {
    %c0_i32 = arith.constant 0 : i32
    %c0_i32_0 = arith.constant 0 : i32
    return %c0_i32, %arg1 : i32, i32
  }
  func.func @transform_4(%arg0: i32, %arg1: i32, %arg2: i32) -> (i32, i32) {
    %c0_i32 = arith.constant 0 : i32
    return %arg0, %arg1 : i32, i32
  }
}

module attributes {stable_mosaic.version = 11 : i64} {
  func.func @_quantize_kernel(%arg0: i32, %arg1: memref<32x32xbf16, #tpu.memory_space<vmem>>, %arg2: memref<32x128xbf16, #tpu.memory_space<vmem>>, %arg3: memref<1x128xf32, #tpu.memory_space<vmem>>, %arg4: memref<128x128xbf16, #tpu.memory_space<vmem>>, %arg5: memref<1x128xf32, #tpu.memory_space<vmem>>, %arg6: memref<128x32xbf16, #tpu.memory_space<vmem>>, %arg7: memref<1x32xf32, #tpu.memory_space<vmem>>, %arg8: memref<1x32xf32, #tpu.memory_space<vmem>>, %arg9: memref<32x32xbf16, #tpu.memory_space<vmem>>, %arg10: memref<1x32x128xi32, #tpu.memory_space<vmem>>, %arg11: memref<1x8x128xf32, #tpu.memory_space<vmem>>) attributes {dimension_semantics = [#tpu.dimension_semantics<parallel>], iteration_bounds = array<i64: 1>, scalar_prefetch = 0 : i64, scratch_operands = 0 : i64, tpu.core_type = #tpu.core_type<tc>, window_params = [{transform_indices = @transform_0, window_bounds = array<i64: 32, 32>}, {pipeline_mode = #tpu.pipeline_mode<synchronous>, transform_indices = @transform_1, window_bounds = array<i64: 32, 128>}, {pipeline_mode = #tpu.pipeline_mode<synchronous>, transform_indices = @transform_2, window_bounds = array<i64: 1, 128>}, {pipeline_mode = #tpu.pipeline_mode<synchronous>, transform_indices = @transform_3, window_bounds = array<i64: 128, 128>}, {pipeline_mode = #tpu.pipeline_mode<synchronous>, transform_indices = @transform_4, window_bounds = array<i64: 1, 128>}, {pipeline_mode = #tpu.pipeline_mode<synchronous>, transform_indices = @transform_5, window_bounds = array<i64: 128, 32>}, {pipeline_mode = #tpu.pipeline_mode<synchronous>, transform_indices = @transform_6, window_bounds = array<i64: 1, 32>}, {pipeline_mode = #tpu.pipeline_mode<synchronous>, transform_indices = @transform_7, window_bounds = array<i64: 1, 32>}, {transform_indices = @transform_8, window_bounds = array<i64: 32, 32>}, {transform_indices = @transform_9, window_bounds = array<i64: 1, 32, 128>}, {transform_indices = @transform_10, window_bounds = array<i64: 1, 8, 128>}]} {
    %c0 = arith.constant 0 : index
    %c0_0 = arith.constant 0 : index
    %0 = vector.load %arg1[%c0, %c0_0] : memref<32x32xbf16, #tpu.memory_space<vmem>>, vector<32x32xbf16>
    %c0_1 = arith.constant 0 : index
    %c0_2 = arith.constant 0 : index
    %1 = vector.load %arg2[%c0_1, %c0_2] : memref<32x128xbf16, #tpu.memory_space<vmem>>, vector<32x128xbf16>
    %cst = arith.constant dense<0.000000e+00> : vector<32x128xf32>
    %2 = tpu.matmul %0, %1, %cst {dimension_numbers = #tpu.dot_dimension_numbers<[1], [0], [0], [1], [0, 0, 1, 1], [], []>} : vector<32x32xbf16>, vector<32x128xbf16>, vector<32x128xf32> -> vector<32x128xf32>
    %c0_3 = arith.constant 0 : index
    %c0_4 = arith.constant 0 : index
    %3 = vector.load %arg3[%c0_3, %c0_4] : memref<1x128xf32, #tpu.memory_space<vmem>>, vector<1x128xf32>
    %4 = vector.broadcast %3 : vector<1x128xf32> to vector<32x128xf32>
    %5 = arith.addf %2, %4 : vector<32x128xf32>
    %6 = arith.truncf %5 : vector<32x128xf32> to vector<32x128xbf16>
    %c0_5 = arith.constant 0 : index
    %c0_6 = arith.constant 0 : index
    %7 = vector.load %arg4[%c0_5, %c0_6] : memref<128x128xbf16, #tpu.memory_space<vmem>>, vector<128x128xbf16>
    %cst_7 = arith.constant dense<0.000000e+00> : vector<32x128xf32>
    %8 = tpu.matmul %6, %7, %cst_7 {dimension_numbers = #tpu.dot_dimension_numbers<[1], [1], [0], [0], [0, 0, 1, 0], [], []>} : vector<32x128xbf16>, vector<128x128xbf16>, vector<32x128xf32> -> vector<32x128xf32>
    %c0_8 = arith.constant 0 : index
    %c0_9 = arith.constant 0 : index
    %9 = vector.load %arg5[%c0_8, %c0_9] : memref<1x128xf32, #tpu.memory_space<vmem>>, vector<1x128xf32>
    %cst_10 = arith.constant 2.000000e+00 : f32
    %10 = vector.broadcast %cst_10 : f32 to vector<32x128xf32>
    %11 = arith.mulf %10, %8 : vector<32x128xf32>
    %12 = vector.broadcast %9 : vector<1x128xf32> to vector<32x128xf32>
    %13 = arith.subf %12, %11 : vector<32x128xf32>
    %cst_11 = arith.constant dense<0x7F800000> : vector<32xf32>
    %14 = vector.multi_reduction <minimumf>, %13, %cst_11 [1] : vector<32x128xf32> to vector<32xf32>
    %15 = vector.shape_cast %14 : vector<32xf32> to vector<32x1xf32>
    %16 = tpu.iota {dimensions = array<i32: 1>} : vector<32x128xi32>
    %17 = vector.broadcast %15 : vector<32x1xf32> to vector<32x128xf32>
    %18 = arith.cmpf ole, %13, %17 : vector<32x128xf32>
    %c128_i32 = arith.constant 128 : i32
    %19 = vector.broadcast %c128_i32 : i32 to vector<32x128xi32>
    %20 = arith.select %18, %16, %19 : vector<32x128xi1>, vector<32x128xi32>
    %cst_12 = arith.constant dense<2147483647> : vector<32xi32>
    %21 = vector.multi_reduction <minsi>, %20, %cst_12 [1] : vector<32x128xi32> to vector<32xi32>
    %22 = vector.shape_cast %21 : vector<32xi32> to vector<32x1xi32>
    %23 = vector.broadcast %22 : vector<32x1xi32> to vector<32x128xi32>
    %24 = arith.cmpi eq, %16, %23 : vector<32x128xi32>
    %25 = arith.extui %24 : vector<32x128xi1> to vector<32x128xi32>
    %26 = arith.sitofp %25 : vector<32x128xi32> to vector<32x128xf32>
    %27 = arith.truncf %26 : vector<32x128xf32> to vector<32x128xbf16>
    %c0_13 = arith.constant 0 : index
    %c0_14 = arith.constant 0 : index
    %28 = vector.load %arg4[%c0_13, %c0_14] : memref<128x128xbf16, #tpu.memory_space<vmem>>, vector<128x128xbf16>
    %cst_15 = arith.constant dense<0.000000e+00> : vector<32x128xf32>
    %29 = tpu.matmul %27, %28, %cst_15 {dimension_numbers = #tpu.dot_dimension_numbers<[1], [0], [0], [1], [0, 0, 1, 1], [], []>} : vector<32x128xbf16>, vector<128x128xbf16>, vector<32x128xf32> -> vector<32x128xf32>
    %30 = vector.shape_cast %22 : vector<32x1xi32> to vector<32x1xi32>
    %31 = vector.broadcast %30 : vector<32x1xi32> to vector<32x128xi32>
    %c0_16 = arith.constant 0 : index
    %c0_17 = arith.constant 0 : index
    %c0_18 = arith.constant 0 : index
    %32 = vector.load %arg10[%c0_16, %c0_17, %c0_18] : memref<1x32x128xi32, #tpu.memory_space<vmem>>, vector<1x32x128xi32>
    %33 = vector.shape_cast %32 : vector<1x32x128xi32> to vector<32x128xi32>
    %34 = vector.shape_cast %31 : vector<32x128xi32> to vector<1x32x128xi32>
    tpu.vector_store %arg10[%c0_16, %c0_17, %c0_18], %34 {strides = array<i32>} : memref<1x32x128xi32, #tpu.memory_space<vmem>>, vector<1x32x128xi32>,
    %c32_i32 = arith.constant 32 : i32
    %35 = arith.muli %arg0, %c32_i32 : i32
    %36 = tpu.iota {dimensions = array<i32: 0>} : vector<32x1xi32>
    %37 = vector.broadcast %35 : i32 to vector<32x1xi32>
    %38 = arith.addi %37, %36 : vector<32x1xi32>
    %c32_i32_19 = arith.constant 32 : i32
    %39 = vector.broadcast %c32_i32_19 : i32 to vector<32x1xi32>
    %40 = arith.cmpi slt, %38, %39 : vector<32x1xi32>
    %41 = arith.extui %40 : vector<32x1xi1> to vector<32x1xi32>
    %42 = arith.sitofp %41 : vector<32x1xi32> to vector<32x1xf32>
    %43 = arith.subf %29, %5 : vector<32x128xf32>
    %44 = vector.broadcast %42 : vector<32x1xf32> to vector<32x128xf32>
    %45 = arith.mulf %43, %44 : vector<32x128xf32>
    %46 = arith.mulf %45, %45 : vector<32x128xf32>
    %cst_20 = arith.constant dense<0.000000e+00> : vector<32xf32>
    %47 = vector.multi_reduction <add>, %46, %cst_20 [1] : vector<32x128xf32> to vector<32xf32>
    %48 = vector.shape_cast %47 : vector<32xf32> to vector<32x1xf32>
    %cst_21 = arith.constant dense<0.000000e+00> : vector<1xf32>
    %49 = vector.multi_reduction <add>, %48, %cst_21 [0] : vector<32x1xf32> to vector<1xf32>
    %50 = vector.shape_cast %49 : vector<1xf32> to vector<1x1xf32>
    %51 = vector.shape_cast %50 : vector<1x1xf32> to vector<1x1xf32>
    %52 = vector.broadcast %51 : vector<1x1xf32> to vector<8x128xf32>
    %c0_22 = arith.constant 0 : index
    %c0_23 = arith.constant 0 : index
    %c0_24 = arith.constant 0 : index
    %53 = vector.load %arg11[%c0_22, %c0_23, %c0_24] : memref<1x8x128xf32, #tpu.memory_space<vmem>>, vector<1x8x128xf32>
    %54 = vector.shape_cast %53 : vector<1x8x128xf32> to vector<8x128xf32>
    %55 = vector.shape_cast %52 : vector<8x128xf32> to vector<1x8x128xf32>
    tpu.vector_store %arg11[%c0_22, %c0_23, %c0_24], %55 {strides = array<i32>} : memref<1x8x128xf32, #tpu.memory_space<vmem>>, vector<1x8x128xf32>,
    %56 = arith.truncf %29 : vector<32x128xf32> to vector<32x128xbf16>
    %c0_25 = arith.constant 0 : index
    %c0_26 = arith.constant 0 : index
    %57 = vector.load %arg6[%c0_25, %c0_26] : memref<128x32xbf16, #tpu.memory_space<vmem>>, vector<128x32xbf16>
    %cst_27 = arith.constant dense<0.000000e+00> : vector<32x32xf32>
    %58 = tpu.matmul %56, %57, %cst_27 {dimension_numbers = #tpu.dot_dimension_numbers<[1], [0], [0], [1], [0, 0, 1, 1], [], []>} : vector<32x128xbf16>, vector<128x32xbf16>, vector<32x32xf32> -> vector<32x32xf32>
    %c0_28 = arith.constant 0 : index
    %c0_29 = arith.constant 0 : index
    %59 = vector.load %arg7[%c0_28, %c0_29] : memref<1x32xf32, #tpu.memory_space<vmem>>, vector<1x32xf32>
    %60 = vector.broadcast %59 : vector<1x32xf32> to vector<32x32xf32>
    %61 = arith.mulf %58, %60 : vector<32x32xf32>
    %c0_30 = arith.constant 0 : index
    %c0_31 = arith.constant 0 : index
    %62 = vector.load %arg8[%c0_30, %c0_31] : memref<1x32xf32, #tpu.memory_space<vmem>>, vector<1x32xf32>
    %63 = vector.broadcast %62 : vector<1x32xf32> to vector<32x32xf32>
    %64 = arith.addf %61, %63 : vector<32x32xf32>
    %65 = arith.truncf %64 : vector<32x32xf32> to vector<32x32xbf16>
    %c0_32 = arith.constant 0 : index
    %c0_33 = arith.constant 0 : index
    %66 = vector.load %arg9[%c0_32, %c0_33] : memref<32x32xbf16, #tpu.memory_space<vmem>>, vector<32x32xbf16>
    tpu.vector_store %arg9[%c0_32, %c0_33], %65 {strides = array<i32>} : memref<32x32xbf16, #tpu.memory_space<vmem>>, vector<32x32xbf16>,
    return
  }
  func.func @transform_0(%arg0: i32) -> (i32, i32) {
    %c0_i32 = arith.constant 0 : i32
    %c0_i32_0 = arith.constant 0 : i32
    return %arg0, %c0_i32 : i32, i32
  }
  func.func @transform_1(%arg0: i32) -> (i32, i32) {
    %c0_i32 = arith.constant 0 : i32
    %c0_i32_0 = arith.constant 0 : i32
    %c0_i32_1 = arith.constant 0 : i32
    return %c0_i32, %c0_i32_0 : i32, i32
  }
  func.func @transform_2(%arg0: i32) -> (i32, i32) {
    %c0_i32 = arith.constant 0 : i32
    %c0_i32_0 = arith.constant 0 : i32
    %c0_i32_1 = arith.constant 0 : i32
    return %c0_i32, %c0_i32_0 : i32, i32
  }
  func.func @transform_3(%arg0: i32) -> (i32, i32) {
    %c0_i32 = arith.constant 0 : i32
    %c0_i32_0 = arith.constant 0 : i32
    %c0_i32_1 = arith.constant 0 : i32
    return %c0_i32, %c0_i32_0 : i32, i32
  }
  func.func @transform_4(%arg0: i32) -> (i32, i32) {
    %c0_i32 = arith.constant 0 : i32
    %c0_i32_0 = arith.constant 0 : i32
    %c0_i32_1 = arith.constant 0 : i32
    return %c0_i32, %c0_i32_0 : i32, i32
  }
  func.func @transform_5(%arg0: i32) -> (i32, i32) {
    %c0_i32 = arith.constant 0 : i32
    %c0_i32_0 = arith.constant 0 : i32
    %c0_i32_1 = arith.constant 0 : i32
    return %c0_i32, %c0_i32_0 : i32, i32
  }
  func.func @transform_6(%arg0: i32) -> (i32, i32) {
    %c0_i32 = arith.constant 0 : i32
    %c0_i32_0 = arith.constant 0 : i32
    %c0_i32_1 = arith.constant 0 : i32
    return %c0_i32, %c0_i32_0 : i32, i32
  }
  func.func @transform_7(%arg0: i32) -> (i32, i32) {
    %c0_i32 = arith.constant 0 : i32
    %c0_i32_0 = arith.constant 0 : i32
    %c0_i32_1 = arith.constant 0 : i32
    return %c0_i32, %c0_i32_0 : i32, i32
  }
  func.func @transform_8(%arg0: i32) -> (i32, i32) {
    %c0_i32 = arith.constant 0 : i32
    %c0_i32_0 = arith.constant 0 : i32
    return %arg0, %c0_i32 : i32, i32
  }
  func.func @transform_9(%arg0: i32) -> (i32, i32, i32) {
    %c0_i32 = arith.constant 0 : i32
    %c0_i32_0 = arith.constant 0 : i32
    %c0_i32_1 = arith.constant 0 : i32
    return %arg0, %c0_i32, %c0_i32_0 : i32, i32, i32
  }
  func.func @transform_10(%arg0: i32) -> (i32, i32, i32) {
    %c0_i32 = arith.constant 0 : i32
    %c0_i32_0 = arith.constant 0 : i32
    %c0_i32_1 = arith.constant 0 : i32
    return %arg0, %c0_i32, %c0_i32_0 : i32, i32, i32
  }
}

module attributes {stable_mosaic.version = 11 : i64} {
  func.func @_fused_matmul_kernel(%arg0: i32, %arg1: i32, %arg2: i32, %arg3: memref<32x288xbf16, #tpu.memory_space<vmem>>, %arg4: memref<288x64xbf16, #tpu.memory_space<vmem>>, %arg5: memref<1x64xf32, #tpu.memory_space<vmem>>, %arg6: memref<1x64xf32, #tpu.memory_space<vmem>>, %arg7: memref<32x64xbf16, #tpu.memory_space<vmem>>, %arg8: memref<32x64xf32, #tpu.memory_space<vmem>>) attributes {dimension_semantics = [#tpu.dimension_semantics<parallel>, #tpu.dimension_semantics<parallel>, #tpu.dimension_semantics<arbitrary>], iteration_bounds = array<i64: 1, 1, 1>, scalar_prefetch = 0 : i64, scratch_operands = 1 : i64, tpu.core_type = #tpu.core_type<tc>, window_params = [{transform_indices = @transform_0, window_bounds = array<i64: 32, 288>}, {transform_indices = @transform_1, window_bounds = array<i64: 288, 64>}, {transform_indices = @transform_2, window_bounds = array<i64: 1, 64>}, {transform_indices = @transform_3, window_bounds = array<i64: 1, 64>}, {transform_indices = @transform_4, window_bounds = array<i64: 32, 64>}]} {
    %c0_i32 = arith.constant 0 : i32
    %0 = arith.cmpi eq, %arg2, %c0_i32 : i32
    %1 = arith.extui %0 : i1 to i32
    %c0_i32_0 = arith.constant 0 : i32
    %2 = arith.cmpi ne, %1, %c0_i32_0 : i32
    scf.if %2 {
      %cst_10 = arith.constant 0.000000e+00 : f32
      %12 = vector.broadcast %cst_10 : f32 to vector<32x64xf32>
      %c0_11 = arith.constant 0 : index
      %c0_12 = arith.constant 0 : index
      %13 = vector.load %arg8[%c0_11, %c0_12] : memref<32x64xf32, #tpu.memory_space<vmem>>, vector<32x64xf32>
      tpu.vector_store %arg8[%c0_11, %c0_12], %12 {strides = array<i32>} : memref<32x64xf32, #tpu.memory_space<vmem>>, vector<32x64xf32>,
    } else {
    }
    %c0 = arith.constant 0 : index
    %c0_1 = arith.constant 0 : index
    %3 = vector.load %arg8[%c0, %c0_1] : memref<32x64xf32, #tpu.memory_space<vmem>>, vector<32x64xf32>
    %c0_2 = arith.constant 0 : index
    %c0_3 = arith.constant 0 : index
    %4 = vector.load %arg3[%c0_2, %c0_3] : memref<32x288xbf16, #tpu.memory_space<vmem>>, vector<32x288xbf16>
    %c0_4 = arith.constant 0 : index
    %c0_5 = arith.constant 0 : index
    %5 = vector.load %arg4[%c0_4, %c0_5] : memref<288x64xbf16, #tpu.memory_space<vmem>>, vector<288x64xbf16>
    %cst = arith.constant dense<0.000000e+00> : vector<32x64xf32>
    %6 = tpu.matmul %4, %5, %cst {dimension_numbers = #tpu.dot_dimension_numbers<[1], [0], [0], [1], [0, 0, 1, 1], [], []>} : vector<32x288xbf16>, vector<288x64xbf16>, vector<32x64xf32> -> vector<32x64xf32>
    %7 = arith.addf %3, %6 : vector<32x64xf32>
    %c0_6 = arith.constant 0 : index
    %c0_7 = arith.constant 0 : index
    %8 = vector.load %arg8[%c0_6, %c0_7] : memref<32x64xf32, #tpu.memory_space<vmem>>, vector<32x64xf32>
    tpu.vector_store %arg8[%c0_6, %c0_7], %7 {strides = array<i32>} : memref<32x64xf32, #tpu.memory_space<vmem>>, vector<32x64xf32>,
    %c0_i32_8 = arith.constant 0 : i32
    %9 = arith.cmpi eq, %arg2, %c0_i32_8 : i32
    %10 = arith.extui %9 : i1 to i32
    %c0_i32_9 = arith.constant 0 : i32
    %11 = arith.cmpi ne, %10, %c0_i32_9 : i32
    scf.if %11 {
      %c0_10 = arith.constant 0 : index
      %c0_11 = arith.constant 0 : index
      %12 = vector.load %arg8[%c0_10, %c0_11] : memref<32x64xf32, #tpu.memory_space<vmem>>, vector<32x64xf32>
      %c0_12 = arith.constant 0 : index
      %c0_13 = arith.constant 0 : index
      %13 = vector.load %arg5[%c0_12, %c0_13] : memref<1x64xf32, #tpu.memory_space<vmem>>, vector<1x64xf32>
      %14 = vector.broadcast %13 : vector<1x64xf32> to vector<32x64xf32>
      %15 = arith.mulf %12, %14 : vector<32x64xf32>
      %c0_14 = arith.constant 0 : index
      %c0_15 = arith.constant 0 : index
      %16 = vector.load %arg6[%c0_14, %c0_15] : memref<1x64xf32, #tpu.memory_space<vmem>>, vector<1x64xf32>
      %17 = vector.broadcast %16 : vector<1x64xf32> to vector<32x64xf32>
      %18 = arith.addf %15, %17 : vector<32x64xf32>
      %cst_16 = arith.constant 0.000000e+00 : f32
      %19 = vector.broadcast %cst_16 : f32 to vector<32x64xf32>
      %20 = arith.maximumf %18, %19 : vector<32x64xf32>
      %21 = arith.truncf %20 : vector<32x64xf32> to vector<32x64xbf16>
      %c0_17 = arith.constant 0 : index
      %c0_18 = arith.constant 0 : index
      %22 = vector.load %arg7[%c0_17, %c0_18] : memref<32x64xbf16, #tpu.memory_space<vmem>>, vector<32x64xbf16>
      tpu.vector_store %arg7[%c0_17, %c0_18], %21 {strides = array<i32>} : memref<32x64xbf16, #tpu.memory_space<vmem>>, vector<32x64xbf16>,
    } else {
    }
    return
  }
  func.func @transform_0(%arg0: i32, %arg1: i32, %arg2: i32) -> (i32, i32) {
    %c0_i32 = arith.constant 0 : i32
    return %arg0, %arg2 : i32, i32
  }
  func.func @transform_1(%arg0: i32, %arg1: i32, %arg2: i32) -> (i32, i32) {
    %c0_i32 = arith.constant 0 : i32
    return %arg2, %arg1 : i32, i32
  }
  func.func @transform_2(%arg0: i32, %arg1: i32, %arg2: i32) -> (i32, i32) {
    %c0_i32 = arith.constant 0 : i32
    %c0_i32_0 = arith.constant 0 : i32
    return %c0_i32, %arg1 : i32, i32
  }
  func.func @transform_3(%arg0: i32, %arg1: i32, %arg2: i32) -> (i32, i32) {
    %c0_i32 = arith.constant 0 : i32
    %c0_i32_0 = arith.constant 0 : i32
    return %c0_i32, %arg1 : i32, i32
  }
  func.func @transform_4(%arg0: i32, %arg1: i32, %arg2: i32) -> (i32, i32) {
    %c0_i32 = arith.constant 0 : i32
    return %arg0, %arg1 : i32, i32
  }
}

module attributes {stable_mosaic.version = 11 : i64} {
  func.func @_fused_matmul_kernel(%arg0: i32, %arg1: i32, %arg2: i32, %arg3: memref<128x144xbf16, #tpu.memory_space<vmem>>, %arg4: memref<144x12xbf16, #tpu.memory_space<vmem>>, %arg5: memref<1x12xf32, #tpu.memory_space<vmem>>, %arg6: memref<1x12xf32, #tpu.memory_space<vmem>>, %arg7: memref<128x12xf32, #tpu.memory_space<vmem>>, %arg8: memref<128x12xf32, #tpu.memory_space<vmem>>) attributes {dimension_semantics = [#tpu.dimension_semantics<parallel>, #tpu.dimension_semantics<parallel>, #tpu.dimension_semantics<arbitrary>], iteration_bounds = array<i64: 1, 1, 1>, scalar_prefetch = 0 : i64, scratch_operands = 1 : i64, tpu.core_type = #tpu.core_type<tc>, window_params = [{transform_indices = @transform_0, window_bounds = array<i64: 128, 144>}, {transform_indices = @transform_1, window_bounds = array<i64: 144, 12>}, {transform_indices = @transform_2, window_bounds = array<i64: 1, 12>}, {transform_indices = @transform_3, window_bounds = array<i64: 1, 12>}, {transform_indices = @transform_4, window_bounds = array<i64: 128, 12>}]} {
    %c0_i32 = arith.constant 0 : i32
    %0 = arith.cmpi eq, %arg2, %c0_i32 : i32
    %1 = arith.extui %0 : i1 to i32
    %c0_i32_0 = arith.constant 0 : i32
    %2 = arith.cmpi ne, %1, %c0_i32_0 : i32
    scf.if %2 {
      %cst_10 = arith.constant 0.000000e+00 : f32
      %12 = vector.broadcast %cst_10 : f32 to vector<128x12xf32>
      %c0_11 = arith.constant 0 : index
      %c0_12 = arith.constant 0 : index
      %13 = vector.load %arg8[%c0_11, %c0_12] : memref<128x12xf32, #tpu.memory_space<vmem>>, vector<128x12xf32>
      tpu.vector_store %arg8[%c0_11, %c0_12], %12 {strides = array<i32>} : memref<128x12xf32, #tpu.memory_space<vmem>>, vector<128x12xf32>,
    } else {
    }
    %c0 = arith.constant 0 : index
    %c0_1 = arith.constant 0 : index
    %3 = vector.load %arg8[%c0, %c0_1] : memref<128x12xf32, #tpu.memory_space<vmem>>, vector<128x12xf32>
    %c0_2 = arith.constant 0 : index
    %c0_3 = arith.constant 0 : index
    %4 = vector.load %arg3[%c0_2, %c0_3] : memref<128x144xbf16, #tpu.memory_space<vmem>>, vector<128x144xbf16>
    %c0_4 = arith.constant 0 : index
    %c0_5 = arith.constant 0 : index
    %5 = vector.load %arg4[%c0_4, %c0_5] : memref<144x12xbf16, #tpu.memory_space<vmem>>, vector<144x12xbf16>
    %cst = arith.constant dense<0.000000e+00> : vector<128x12xf32>
    %6 = tpu.matmul %4, %5, %cst {dimension_numbers = #tpu.dot_dimension_numbers<[1], [0], [0], [1], [0, 0, 1, 1], [], []>} : vector<128x144xbf16>, vector<144x12xbf16>, vector<128x12xf32> -> vector<128x12xf32>
    %7 = arith.addf %3, %6 : vector<128x12xf32>
    %c0_6 = arith.constant 0 : index
    %c0_7 = arith.constant 0 : index
    %8 = vector.load %arg8[%c0_6, %c0_7] : memref<128x12xf32, #tpu.memory_space<vmem>>, vector<128x12xf32>
    tpu.vector_store %arg8[%c0_6, %c0_7], %7 {strides = array<i32>} : memref<128x12xf32, #tpu.memory_space<vmem>>, vector<128x12xf32>,
    %c0_i32_8 = arith.constant 0 : i32
    %9 = arith.cmpi eq, %arg2, %c0_i32_8 : i32
    %10 = arith.extui %9 : i1 to i32
    %c0_i32_9 = arith.constant 0 : i32
    %11 = arith.cmpi ne, %10, %c0_i32_9 : i32
    scf.if %11 {
      %c0_10 = arith.constant 0 : index
      %c0_11 = arith.constant 0 : index
      %12 = vector.load %arg8[%c0_10, %c0_11] : memref<128x12xf32, #tpu.memory_space<vmem>>, vector<128x12xf32>
      %c0_12 = arith.constant 0 : index
      %c0_13 = arith.constant 0 : index
      %13 = vector.load %arg5[%c0_12, %c0_13] : memref<1x12xf32, #tpu.memory_space<vmem>>, vector<1x12xf32>
      %14 = vector.broadcast %13 : vector<1x12xf32> to vector<128x12xf32>
      %15 = arith.mulf %12, %14 : vector<128x12xf32>
      %c0_14 = arith.constant 0 : index
      %c0_15 = arith.constant 0 : index
      %16 = vector.load %arg6[%c0_14, %c0_15] : memref<1x12xf32, #tpu.memory_space<vmem>>, vector<1x12xf32>
      %17 = vector.broadcast %16 : vector<1x12xf32> to vector<128x12xf32>
      %18 = arith.addf %15, %17 : vector<128x12xf32>
      %19 = math.tanh %18 : vector<128x12xf32>
      %c0_16 = arith.constant 0 : index
      %c0_17 = arith.constant 0 : index
      %20 = vector.load %arg7[%c0_16, %c0_17] : memref<128x12xf32, #tpu.memory_space<vmem>>, vector<128x12xf32>
      tpu.vector_store %arg7[%c0_16, %c0_17], %19 {strides = array<i32>} : memref<128x12xf32, #tpu.memory_space<vmem>>, vector<128x12xf32>,
    } else {
    }
    return
  }
  func.func @transform_0(%arg0: i32, %arg1: i32, %arg2: i32) -> (i32, i32) {
    %c0_i32 = arith.constant 0 : i32
    return %arg0, %arg2 : i32, i32
  }
  func.func @transform_1(%arg0: i32, %arg1: i32, %arg2: i32) -> (i32, i32) {
    %c0_i32 = arith.constant 0 : i32
    return %arg2, %arg1 : i32, i32
  }
  func.func @transform_2(%arg0: i32, %arg1: i32, %arg2: i32) -> (i32, i32) {
    %c0_i32 = arith.constant 0 : i32
    %c0_i32_0 = arith.constant 0 : i32
    return %c0_i32, %arg1 : i32, i32
  }
  func.func @transform_3(%arg0: i32, %arg1: i32, %arg2: i32) -> (i32, i32) {
    %c0_i32 = arith.constant 0 : i32
    %c0_i32_0 = arith.constant 0 : i32
    return %c0_i32, %arg1 : i32, i32
  }
  func.func @transform_4(%arg0: i32, %arg1: i32, %arg2: i32) -> (i32, i32) {
    %c0_i32 = arith.constant 0 : i32
    return %arg0, %arg1 : i32, i32
  }
}

</mosaic_0001>

<bundles_post_ra>
// kernel: vqvae_forward.5
= control target key start
LH: loop header
LB: loop body
LE: loop exit
PB: predicated region body
PF: predicated region fallthrough
CT: control target
= control target key end

     0   :  { %vm22_vm0 = vcmask 130048   ;;  %v429_v1 = vmov 0.0   ;;  %vm135_vm1 = vcmask 392192   ;;  %vm333_vm2 = vcmask 125952   ;;  %s634_s1 = inlined_call_operand.vmem [shape: bf16[48,16], index: 1, kind: input, shape index: {}]   ;;  %s635_s2 = inlined_call_operand.vmem [shape: f32[1,16], index: 2, kind: input, shape index: {}]   ;;  %s636_s3 = inlined_call_operand.vmem [shape: f32[1,16], index: 3, kind: input, shape index: {}]   ;;  %s637_s0 = inlined_call_operand.vmem [shape: bf16[128,48], index: 0, kind: input, shape index: {}]   ;;  %s638_s4 = inlined_call_operand.vmem [shape: bf16[128,16], index: 4, kind: output, shape index: {}]  }
   0x1   :  { %v416_v0 = vld [vmem:[%s634_s1 + $0x10] sm:$0xff]  ;;  %23 = vst.msk [vmem:[#allocation2] sm:$0xff] %vm22_vm0, %v429_v1  ;;  %v415_v2 = vld [vmem:[%s634_s1 + $0x8] sm:$0xff]  ;;  %v414_v3 = vld [vmem:[%s634_s1] sm:$0xff] }
   0x2   :  { %24 = vst.msk [vmem:[#allocation2 + $0x8] sm:$0xff] %vm22_vm0, %v429_v1  ;;  %165 = vmatpush.bf16.msra.mxu0 %v416_v0  ;;  %417 = vmatpush.bf16.msra.mxu1 %v416_v0  ;;  %v406_v4 = vld [vmem:[%s637_s0] sm:$0xff]  ;;  %v408_v5 = vld [vmem:[%s637_s0 + $0x10] sm:$0xff]  ;;  %v407_v8 = vld [vmem:[%s637_s0 + $0x8] sm:$0xff] }
   0x3   :  { %25 = vst.msk [vmem:[#allocation2 + $0x10] sm:$0xff] %vm22_vm0, %v429_v1  ;;  %418 = vmatpush.bf16.msra.mxu2 %v416_v0  ;;  %419 = vmatpush.bf16.msra.mxu3 %v416_v0  ;;  %v410_v6 = vld [vmem:[%s637_s0 + $0x20] sm:$0xff]  ;;  %v412_v7 = vld [vmem:[%s637_s0 + $0x30] sm:$0xff]  ;;  %v409_v9 = vld [vmem:[%s637_s0 + $0x18] sm:$0xff] }
   0x4   :  { %26 = vst.msk [vmem:[#allocation2 + $0x18] sm:$0xff] %vm22_vm0, %v429_v1  ;;  %v411_v10 = vld [vmem:[%s637_s0 + $0x28] sm:$0xff]  ;;  %v413_v11 = vld [vmem:[%s637_s0 + $0x38] sm:$0xff]  ;;  %v517_v22 = vld [vmem:[%s635_s2] ss:$0 sm:$0xff] }
   0x5   :  { %27 = vst.msk [vmem:[#allocation2 + $0x20] sm:$0xff] %vm22_vm0, %v429_v1  ;;  %v522_v29 = vld [vmem:[%s636_s3] ss:$0 sm:$0xff] }
   0x6   :  { %28 = vst.msk [vmem:[#allocation2 + $0x28] sm:$0xff] %vm22_vm0, %v429_v1  ;;  %166 = vmatpush.bf16.msra.mxu0 %v415_v2  ;;  %420 = vmatpush.bf16.msra.mxu1 %v415_v2 }
   0x7   :  { %29 = vst.msk [vmem:[#allocation2 + $0x30] sm:$0xff] %vm22_vm0, %v429_v1  ;;  %421 = vmatpush.bf16.msra.mxu2 %v415_v2  ;;  %422 = vmatpush.bf16.msra.mxu3 %v415_v2 }
   0x8   :  { %30 = vst.msk [vmem:[#allocation2 + $0x38] sm:$0xff] %vm22_vm0, %v429_v1  ;;  %v39_v12 = vld [vmem:[#allocation2] sm:$0xff] }
   0x9   :  { %31 = vst.msk [vmem:[#allocation2 + $0x40] sm:$0xff] %vm22_vm0, %v429_v1  ;;  %v40_v20 = vld [vmem:[#allocation2 + $0x8] sm:$0xff] }
   0xa   :  { %32 = vst.msk [vmem:[#allocation2 + $0x48] sm:$0xff] %vm22_vm0, %v429_v1  ;;  %167 = vmatpush.bf16.msra.mxu0 %v414_v3  ;;  %423 = vmatpush.bf16.msra.mxu1 %v414_v3  ;;  %v41_v43 = vld [vmem:[#allocation2 + $0x10] sm:$0xff] }
   0xb   :  { %33 = vst.msk [vmem:[#allocation2 + $0x50] sm:$0xff] %vm22_vm0, %v429_v1  ;;  %424 = vmatpush.bf16.msra.mxu2 %v414_v3  ;;  %425 = vmatpush.bf16.msra.mxu3 %v414_v3 }
   0xc   :  { %34 = vst.msk [vmem:[#allocation2 + $0x58] sm:$0xff] %vm22_vm0, %v429_v1  ;;  %v43_v13 = vld [vmem:[#allocation2 + $0x20] sm:$0xff] }
   0xd   :  { %35 = vst.msk [vmem:[#allocation2 + $0x60] sm:$0xff] %vm22_vm0, %v429_v1  ;;  %398 = vmatmul.msk.bf16.vlgmr.msra.gmra.mxu0 %vm135_vm1, %v406_v4  ;;  %400 = vmatmul.msk.bf16.vlgmr.msra.gmra.mxu1 %vm135_vm1, %v408_v5  ;;  %v44_v21 = vld [vmem:[#allocation2 + $0x28] sm:$0xff] }
   0xe   :  { %36 = vst.msk [vmem:[#allocation2 + $0x68] sm:$0xff] %vm22_vm0, %v429_v1  ;;  %402 = vmatmul.msk.bf16.vlgmr.msra.gmra.mxu2 %vm135_vm1, %v410_v6  ;;  %404 = vmatmul.msk.bf16.vlgmr.msra.gmra.mxu3 %vm135_vm1, %v412_v7  ;;  %v45_v47 = vld [vmem:[#allocation2 + $0x30] sm:$0xff] }
   0xf   :  { %37 = vst.msk [vmem:[#allocation2 + $0x70] sm:$0xff] %vm22_vm0, %v429_v1 }
  0x10   :  { %38 = vst.msk [vmem:[#allocation2 + $0x78] sm:$0xff] %vm22_vm0, %v429_v1  ;;  %v47_v18 = vld [vmem:[#allocation2 + $0x40] sm:$0xff] }
  0x11   :  { %v48_v37 = vld [vmem:[#allocation2 + $0x48] sm:$0xff] }
  0x12   :  { %v49_v4 = vld [vmem:[#allocation2 + $0x50] sm:$0xff] }
  0x14   :  { %v51_v19 = vld [vmem:[#allocation2 + $0x60] sm:$0xff] }
  0x15   :  { %v52_v39 = vld [vmem:[#allocation2 + $0x68] sm:$0xff] }
  0x1d   :  { %399 = vmatmul.msk.bf16.gmra.mxu0 %vm135_vm1, %v407_v8  ;;  %401 = vmatmul.msk.bf16.gmra.mxu1 %vm135_vm1, %v409_v9  ;;  %v53_v9 = vld [vmem:[#allocation2 + $0x70] sm:$0xff] }
  0x1e   :  { %403 = vmatmul.msk.bf16.gmra.mxu2 %vm135_vm1, %v411_v10  ;;  %405 = vmatmul.msk.bf16.gmra.mxu3 %vm135_vm1, %v413_v11 }
  0x8a   :  { %v169_v14 = vpop.f32.mrf.mxu0  ;;  %v179_v15 = vpop.f32.mrf.mxu1 }
  0x8b   :  { %v209_v16 = vadd.f32 %v169_v14, %v39_v12  ;;  %v213_v17 = vadd.f32 %v179_v15, %v43_v13  ;;  %v42_v13 = vld [vmem:[#allocation2 + $0x18] sm:$0xff] }
  0x8d   :  { %226 = vst.msk [vmem:[#allocation2] sm:$0xff] %vm22_vm0, %v209_v16 }
  0x8e   :  { %230 = vst.msk [vmem:[#allocation2 + $0x20] sm:$0xff] %vm22_vm0, %v213_v17 }
  0x91   :  { %v189_v23 = vpop.f32.mrf.mxu2  ;;  %v199_v24 = vpop.f32.mrf.mxu3 }
  0x92   :  { %v217_v25 = vadd.f32 %v189_v23, %v47_v18  ;;  %v221_v26 = vadd.f32 %v199_v24, %v51_v19  ;;  %v171_v27 = vpop.f32.mrf.mxu0  ;;  %v181_v28 = vpop.f32.mrf.mxu1  ;;  %v46_v18 = vld [vmem:[#allocation2 + $0x38] sm:$0xff] }
  0x93   :  { %v210_v30 = vadd.f32 %v171_v27, %v40_v20  ;;  %v214_v31 = vadd.f32 %v181_v28, %v44_v21 }
  0x94   :  { %v245_v32 = vld [vmem:[#allocation2] sm:$0xff]  ;;  %234 = vst.msk [vmem:[#allocation2 + $0x40] sm:$0xff] %vm22_vm0, %v217_v25 }
  0x95   :  { %v265_v33 = vmul.f32 %v517_v22, %v245_v32  ;;  %v249_v34 = vld [vmem:[#allocation2 + $0x20] sm:$0xff]  ;;  %238 = vst.msk [vmem:[#allocation2 + $0x60] sm:$0xff] %vm22_vm0, %v221_v26 }
  0x96   :  { %v269_v35 = vmul.f32 %v517_v22, %v249_v34  ;;  %227 = vst.msk [vmem:[#allocation2 + $0x8] sm:$0xff] %vm22_vm0, %v210_v30  ;;  %v50_v30 = vld [vmem:[#allocation2 + $0x58] sm:$0xff] }
  0x97   :  { %v285_v36 = vadd.f32 %v522_v29, %v265_v33  ;;  %231 = vst.msk [vmem:[#allocation2 + $0x28] sm:$0xff] %vm22_vm0, %v214_v31  ;;  %v54_v31 = vld [vmem:[#allocation2 + $0x78] sm:$0xff] }
  0x98   :  { %v289_v38 = vadd.f32 %v522_v29, %v269_v35 }
  0x99   :  { %v301_v40 = vmax.f32 %v285_v36, 0.0  ;;  %v191_v41 = vpop.f32.mrf.mxu2  ;;  %v201_v42 = vpop.f32.mrf.mxu3 }
  0x9a   :  { %v305_v44 = vmax.f32 %v289_v38, 0.0  ;;  %v218_v45 = vadd.f32 %v191_v41, %v48_v37  ;;  %v174_v46 = vpop.f32.mrf.mxu0  ;;  %v184_v48 = vpop.f32.mrf.mxu1  ;;  %v222_v51 = vadd.f32 %v201_v42, %v52_v39 }
  0x9b   :  { %v317_v49 = vpack.c.bf16 %v301_v40, %v301_v40  ;;  %v253_v50 = vld [vmem:[#allocation2 + $0x40] sm:$0xff]  ;;  %v211_v55 = vadd.f32 %v174_v46, %v41_v43  ;;  %v215_v58 = vadd.f32 %v184_v48, %v45_v47 }
  0x9c   :  { %v321_v52 = vpack.c.bf16 %v305_v44, %v305_v44  ;;  %v273_v53 = vmul.f32 %v517_v22, %v253_v50  ;;  %v257_v54 = vld [vmem:[#allocation2 + $0x60] sm:$0xff]  ;;  %235 = vst.msk [vmem:[#allocation2 + $0x48] sm:$0xff] %vm22_vm0, %v218_v45 }
  0x9d   :  { %334 = vst.msk [vmem:[%s638_s4] sm:$0xf] %vm333_vm2, %v317_v49  ;;  %v277_v56 = vmul.f32 %v517_v22, %v257_v54  ;;  %v246_v57 = vld [vmem:[#allocation2 + $0x8] sm:$0xff] }
  0x9e   :  { %338 = vst.msk [vmem:[%s638_s4 + $0x10] sm:$0xf] %vm333_vm2, %v321_v52  ;;  %v293_v59 = vadd.f32 %v522_v29, %v273_v53  ;;  %v266_v60 = vmul.f32 %v517_v22, %v246_v57  ;;  %v250_v61 = vld [vmem:[#allocation2 + $0x28] sm:$0xff] }
  0x9f   :  { %v297_v62 = vadd.f32 %v522_v29, %v277_v56  ;;  %v270_v63 = vmul.f32 %v517_v22, %v250_v61  ;;  %239 = vst.msk [vmem:[#allocation2 + $0x68] sm:$0xff] %vm22_vm0, %v222_v51 }
  0xa0   :  { %v309_v0 = vmax.f32 %v293_v59, 0.0  ;;  %v286_v1 = vadd.f32 %v522_v29, %v266_v60  ;;  %228 = vst.msk [vmem:[#allocation2 + $0x10] sm:$0xff] %vm22_vm0, %v211_v55 }
  0xa1   :  { %v313_v2 = vmax.f32 %v297_v62, 0.0  ;;  %v290_v3 = vadd.f32 %v522_v29, %v270_v63  ;;  %232 = vst.msk [vmem:[#allocation2 + $0x30] sm:$0xff] %vm22_vm0, %v215_v58  ;;  %v194_v5 = vpop.f32.mrf.mxu2  ;;  %v204_v6 = vpop.f32.mrf.mxu3 }
  0xa2   :  { %v325_v7 = vpack.c.bf16 %v309_v0, %v309_v0  ;;  %v302_v8 = vmax.f32 %v286_v1, 0.0  ;;  %v176_v14 = vpop.f32.mrf.mxu0  ;;  %v219_v17 = vadd.f32 %v194_v5, %v49_v4  ;;  %v186_v19 = vpop.f32.mrf.mxu1  ;;  %v223_v21 = vadd.f32 %v204_v6, %v53_v9 }
  0xa3   :  { %v329_v10 = vpack.c.bf16 %v313_v2, %v313_v2  ;;  %v306_v11 = vmax.f32 %v290_v3, 0.0  ;;  %v254_v12 = vld [vmem:[#allocation2 + $0x48] sm:$0xff]  ;;  %v212_v25 = vadd.f32 %v176_v14, %v42_v13  ;;  %v216_v28 = vadd.f32 %v186_v19, %v46_v18 }
  0xa4   :  { %342 = vst.msk [vmem:[%s638_s4 + $0x20] sm:$0xf] %vm333_vm2, %v325_v7  ;;  %v318_v15 = vpack.c.bf16 %v302_v8, %v302_v8  ;;  %v274_v16 = vmul.f32 %v517_v22, %v254_v12 }
  0xa5   :  { %346 = vst.msk [vmem:[%s638_s4 + $0x30] sm:$0xf] %vm333_vm2, %v329_v10  ;;  %v322_v20 = vpack.c.bf16 %v306_v11, %v306_v11 }
  0xa6   :  { %335 = vst.msk [vmem:[%s638_s4 + $0x4] sm:$0xf] %vm333_vm2, %v318_v15  ;;  %v294_v23 = vadd.f32 %v522_v29, %v274_v16  ;;  %v258_v24 = vld [vmem:[#allocation2 + $0x68] sm:$0xff] }
  0xa7   :  { %339 = vst.msk [vmem:[%s638_s4 + $0x14] sm:$0xf] %vm333_vm2, %v322_v20  ;;  %v278_v26 = vmul.f32 %v517_v22, %v258_v24  ;;  %v247_v27 = vld [vmem:[#allocation2 + $0x10] sm:$0xff] }
  0xa8   :  { %v310_v32 = vmax.f32 %v294_v23, 0.0  ;;  %v267_v33 = vmul.f32 %v517_v22, %v247_v27  ;;  %v251_v34 = vld [vmem:[#allocation2 + $0x30] sm:$0xff]  ;;  %236 = vst.msk [vmem:[#allocation2 + $0x50] sm:$0xff] %vm22_vm0, %v219_v17 }
  0xa9   :  { %v298_v35 = vadd.f32 %v522_v29, %v278_v26  ;;  %v271_v36 = vmul.f32 %v517_v22, %v251_v34  ;;  %240 = vst.msk [vmem:[#allocation2 + $0x70] sm:$0xff] %vm22_vm0, %v223_v21  ;;  %v196_v37 = vpop.f32.mrf.mxu2  ;;  %v206_v38 = vpop.f32.mrf.mxu3 }
  0xaa   :  { %v326_v39 = vpack.c.bf16 %v310_v32, %v310_v32  ;;  %v287_v40 = vadd.f32 %v522_v29, %v267_v33  ;;  %229 = vst.msk [vmem:[#allocation2 + $0x18] sm:$0xff] %vm22_vm0, %v212_v25  ;;  %v220_v41 = vadd.f32 %v196_v37, %v50_v30  ;;  %v224_v42 = vadd.f32 %v206_v38, %v54_v31 }
  0xab   :  { %v314_v43 = vmax.f32 %v298_v35, 0.0  ;;  %v291_v44 = vadd.f32 %v522_v29, %v271_v36  ;;  %233 = vst.msk [vmem:[#allocation2 + $0x38] sm:$0xff] %vm22_vm0, %v216_v28 }
  0xac   :  { %343 = vst.msk [vmem:[%s638_s4 + $0x24] sm:$0xf] %vm333_vm2, %v326_v39  ;;  %v303_v45 = vmax.f32 %v287_v40, 0.0 }
  0xad   :  { %v330_v46 = vpack.c.bf16 %v314_v43, %v314_v43  ;;  %v307_v47 = vmax.f32 %v291_v44, 0.0  ;;  %237 = vst.msk [vmem:[#allocation2 + $0x58] sm:$0xff] %vm22_vm0, %v220_v41 }
  0xae   :  { %v319_v48 = vpack.c.bf16 %v303_v45, %v303_v45  ;;  %241 = vst.msk [vmem:[#allocation2 + $0x78] sm:$0xff] %vm22_vm0, %v224_v42 }
  0xaf   :  { %347 = vst.msk [vmem:[%s638_s4 + $0x34] sm:$0xf] %vm333_vm2, %v330_v46  ;;  %v323_v49 = vpack.c.bf16 %v307_v47, %v307_v47  ;;  %v255_v50 = vld [vmem:[#allocation2 + $0x50] sm:$0xff] }
  0xb0   :  { %336 = vst.msk [vmem:[%s638_s4 + $0x8] sm:$0xf] %vm333_vm2, %v319_v48  ;;  %v275_v51 = vmul.f32 %v517_v22, %v255_v50  ;;  %v259_v52 = vld [vmem:[#allocation2 + $0x70] sm:$0xff] }
  0xb1   :  { %340 = vst.msk [vmem:[%s638_s4 + $0x18] sm:$0xf] %vm333_vm2, %v323_v49  ;;  %v279_v53 = vmul.f32 %v517_v22, %v259_v52  ;;  %v248_v54 = vld [vmem:[#allocation2 + $0x18] sm:$0xff] }
  0xb2   :  { %v295_v55 = vadd.f32 %v522_v29, %v275_v51  ;;  %v268_v56 = vmul.f32 %v517_v22, %v248_v54  ;;  %v252_v57 = vld [vmem:[#allocation2 + $0x38] sm:$0xff] }
  0xb3   :  { %v299_v58 = vadd.f32 %v522_v29, %v279_v53  ;;  %v272_v59 = vmul.f32 %v517_v22, %v252_v57 }
  0xb4   :  { %v311_v60 = vmax.f32 %v295_v55, 0.0  ;;  %v288_v61 = vadd.f32 %v522_v29, %v268_v56  ;;  %v256_v62 = vld [vmem:[#allocation2 + $0x58] sm:$0xff] }
  0xb5   :  { %v315_v63 = vmax.f32 %v299_v58, 0.0  ;;  %v292_v0 = vadd.f32 %v522_v29, %v272_v59  ;;  %v276_v1 = vmul.f32 %v517_v22, %v256_v62  ;;  %v260_v2 = vld [vmem:[#allocation2 + $0x78] sm:$0xff] }
  0xb6   :  { %v327_v3 = vpack.c.bf16 %v311_v60, %v311_v60  ;;  %v304_v4 = vmax.f32 %v288_v61, 0.0  ;;  %v280_v5 = vmul.f32 %v517_v22, %v260_v2 }
  0xb7   :  { %v331_v6 = vpack.c.bf16 %v315_v63, %v315_v63  ;;  %v308_v7 = vmax.f32 %v292_v0, 0.0  ;;  %v296_v8 = vadd.f32 %v522_v29, %v276_v1 }
  0xb8   :  { %344 = vst.msk [vmem:[%s638_s4 + $0x28] sm:$0xf] %vm333_vm2, %v327_v3  ;;  %v320_v9 = vpack.c.bf16 %v304_v4, %v304_v4  ;;  %v300_v10 = vadd.f32 %v522_v29, %v280_v5 }
  0xb9   :  { %348 = vst.msk [vmem:[%s638_s4 + $0x38] sm:$0xf] %vm333_vm2, %v331_v6  ;;  %v324_v11 = vpack.c.bf16 %v308_v7, %v308_v7  ;;  %v312_v12 = vmax.f32 %v296_v8, 0.0 }
  0xba   :  { %337 = vst.msk [vmem:[%s638_s4 + $0xc] sm:$0xf] %vm333_vm2, %v320_v9  ;;  %v316_v22 = vmax.f32 %v300_v10, 0.0 }
  0xbb   :  { %341 = vst.msk [vmem:[%s638_s4 + $0x1c] sm:$0xf] %vm333_vm2, %v324_v11  ;;  %v328_v13 = vpack.c.bf16 %v312_v12, %v312_v12 }
  0xbc   :  { %v332_v29 = vpack.c.bf16 %v316_v22, %v316_v22 }
  0xbd   :  { %345 = vst.msk [vmem:[%s638_s4 + $0x2c] sm:$0xf] %vm333_vm2, %v328_v13 }
  0xbe   :  { %349 = vst.msk [vmem:[%s638_s4 + $0x3c] sm:$0xf] %vm333_vm2, %v332_v29 }

// kernel: vqvae_forward.6
= control target key start
LH: loop header
LB: loop body
LE: loop exit
PB: predicated region body
PF: predicated region fallthrough
CT: control target
= control target key end

     0   :  { %vm21_vm0 = vcmask 261120   ;;  %v388_v28 = vmov 0.0   ;;  %vm260_vm1 = vcmask 257024   ;;  %s516_s1 = inlined_call_operand.vmem [shape: bf16[256,32], index: 1, kind: input, shape index: {}]   ;;  %s517_s0 = inlined_call_operand.vmem [shape: bf16[32,256], index: 0, kind: input, shape index: {}]   ;;  %s518_s2 = inlined_call_operand.vmem [shape: f32[1,32], index: 2, kind: input, shape index: {}]   ;;  %s519_s3 = inlined_call_operand.vmem [shape: f32[1,32], index: 3, kind: input, shape index: {}]   ;;  %s520_s4 = inlined_call_operand.vmem [shape: bf16[32,32], index: 4, kind: output, shape index: {}]  }
   0x1   :  { %v360_v0 = vld [vmem:[%s516_s1 + $0x38] sm:$0xff]  ;;  %v359_v2 = vld [vmem:[%s516_s1 + $0x30] sm:$0xff]  ;;  %v358_v4 = vld [vmem:[%s516_s1 + $0x28] sm:$0xff]  ;;  %22 = vst.msk [vmem:[#allocation2] sm:$0xff] %vm21_vm0, %v388_v28 }
   0x2   :  { %v368_v1 = vld [vmem:[%s516_s1 + $0x78] sm:$0xff]  ;;  %182 = vmatpush.bf16.msra.mxu0 %v360_v0  ;;  %369 = vmatpush.bf16.msra.mxu2 %v360_v0  ;;  %v367_v3 = vld [vmem:[%s516_s1 + $0x70] sm:$0xff]  ;;  %v366_v5 = vld [vmem:[%s516_s1 + $0x68] sm:$0xff]  ;;  %23 = vst.msk [vmem:[#allocation2 + $0x8] sm:$0xff] %vm21_vm0, %v388_v28 }
   0x3   :  { %201 = vmatpush.bf16.msra.mxu1 %v368_v1  ;;  %377 = vmatpush.bf16.msra.mxu3 %v368_v1  ;;  %v357_v6 = vld [vmem:[%s516_s1 + $0x20] sm:$0xff]  ;;  %v356_v8 = vld [vmem:[%s516_s1 + $0x18] sm:$0xff]  ;;  %v355_v10 = vld [vmem:[%s516_s1 + $0x10] sm:$0xff]  ;;  %24 = vst.msk [vmem:[#allocation2 + $0x10] sm:$0xff] %vm21_vm0, %v388_v28 }
   0x4   :  { %v365_v7 = vld [vmem:[%s516_s1 + $0x60] sm:$0xff]  ;;  %v364_v9 = vld [vmem:[%s516_s1 + $0x58] sm:$0xff]  ;;  %v363_v11 = vld [vmem:[%s516_s1 + $0x50] sm:$0xff]  ;;  %25 = vst.msk [vmem:[#allocation2 + $0x18] sm:$0xff] %vm21_vm0, %v388_v28 }
   0x5   :  { %v354_v12 = vld [vmem:[%s516_s1 + $0x8] sm:$0xff]  ;;  %v353_v14 = vld [vmem:[%s516_s1] sm:$0xff]  ;;  %v279_v18 = vld [vmem:[%s517_s0 + $0x10] sm:$0xf] }
   0x6   :  { %183 = vmatpush.bf16.msra.mxu0 %v359_v2  ;;  %370 = vmatpush.bf16.msra.mxu2 %v359_v2  ;;  %v362_v13 = vld [vmem:[%s516_s1 + $0x48] sm:$0xff]  ;;  %v361_v15 = vld [vmem:[%s516_s1 + $0x40] sm:$0xff]  ;;  %v352_v19 = vld [vmem:[%s517_s0 + $0x14] sm:$0xf0] }
   0x7   :  { %202 = vmatpush.bf16.msra.mxu1 %v367_v3  ;;  %378 = vmatpush.bf16.msra.mxu3 %v367_v3  ;;  %v271_v16 = vld [vmem:[%s517_s0] sm:$0xf]  ;;  %v350_v17 = vld [vmem:[%s517_s0 + $0x4] sm:$0xf0]  ;;  %v349_v20 = vld [vmem:[%s517_s0 + $0x4] sm:$0xf]  ;;  %v280_v25 = vor.u32 %v352_v19, %v279_v18 }
   0x8   :  { %v273_v21 = vld [vmem:[%s517_s0 + $0x8] sm:$0xf0]  ;;  %v351_v22 = vld [vmem:[%s517_s0 + $0x14] sm:$0xf]  ;;  %v281_v23 = vld [vmem:[%s517_s0 + $0x18] sm:$0xf0]  ;;  %v272_v24 = vor.u32 %v350_v17, %v271_v16 }
   0x9   :  { %v276_v26 = vor.u32 %v349_v20, %v273_v21  ;;  %v284_v27 = vor.u32 %v351_v22, %v281_v23  ;;  %v26_v30 = vld [vmem:[#allocation2] sm:$0xff]  ;;  %v27_v39 = vld [vmem:[#allocation2 + $0x8] sm:$0xff] }
   0xa   :  { %184 = vmatpush.bf16.msra.mxu0 %v358_v4  ;;  %371 = vmatpush.bf16.msra.mxu2 %v358_v4  ;;  %v28_v35 = vld [vmem:[#allocation2 + $0x10] sm:$0xff]  ;;  %v386_v41 = vld [vmem:[%s518_s2] ss:$0 sm:$0xff] }
   0xb   :  { %203 = vmatpush.bf16.msra.mxu1 %v366_v5  ;;  %379 = vmatpush.bf16.msra.mxu3 %v366_v5  ;;  %v387_v44 = vld [vmem:[%s519_s3] ss:$0 sm:$0xff]  ;;  %v29_v49 = vld [vmem:[#allocation2 + $0x18] sm:$0xff] }
   0xe   :  { %185 = vmatpush.bf16.msra.mxu0 %v357_v6  ;;  %372 = vmatpush.bf16.msra.mxu2 %v357_v6 }
   0xf   :  { %204 = vmatpush.bf16.msra.mxu1 %v365_v7  ;;  %380 = vmatpush.bf16.msra.mxu3 %v365_v7 }
  0x12   :  { %186 = vmatpush.bf16.msra.mxu0 %v356_v8  ;;  %373 = vmatpush.bf16.msra.mxu2 %v356_v8 }
  0x13   :  { %205 = vmatpush.bf16.msra.mxu1 %v364_v9  ;;  %381 = vmatpush.bf16.msra.mxu3 %v364_v9 }
  0x16   :  { %187 = vmatpush.bf16.msra.mxu0 %v355_v10  ;;  %374 = vmatpush.bf16.msra.mxu2 %v355_v10 }
  0x17   :  { %206 = vmatpush.bf16.msra.mxu1 %v363_v11  ;;  %382 = vmatpush.bf16.msra.mxu3 %v363_v11 }
  0x1a   :  { %188 = vmatpush.bf16.msra.mxu0 %v354_v12  ;;  %375 = vmatpush.bf16.msra.mxu2 %v354_v12 }
  0x1b   :  { %207 = vmatpush.bf16.msra.mxu1 %v362_v13  ;;  %383 = vmatpush.bf16.msra.mxu3 %v362_v13 }
  0x1e   :  { %189 = vmatpush.bf16.msra.mxu0 %v353_v14  ;;  %376 = vmatpush.bf16.msra.mxu2 %v353_v14 }
  0x1f   :  { %208 = vmatpush.bf16.msra.mxu1 %v361_v15  ;;  %384 = vmatpush.bf16.msra.mxu3 %v361_v15 }
  0x21   :  { %190 = vmatmul.bf16.vlgmr.msra.gmra.mxu0 %v272_v24  ;;  %195 = vmatmul.bf16.vlgmr.msra.gmra.mxu2 %v280_v25 }
  0x22   :  { %209 = vmatmul.bf16.vlgmr.msra.gmra.mxu1 %v276_v26  ;;  %214 = vmatmul.bf16.vlgmr.msra.gmra.mxu3 %v284_v27 }
  0x9e   :  { %v191_v29 = vpop.f32.mrf.mxu0 }
  0x9f   :  { %v210_v31 = vpop.f32.mrf.mxu1 }
  0xa0   :  { %v211_v32 = vadd.f32 %v210_v31, %v191_v29 }
  0xa2   :  { %v220_v33 = vadd.f32 %v211_v32, %v26_v30 }
  0xa4   :  { %225 = vst.msk [vmem:[#allocation2] sm:$0xff] %vm21_vm0, %v220_v33  ;;  %v196_v34 = vpop.f32.mrf.mxu2 }
  0xa5   :  { %v215_v36 = vpop.f32.mrf.mxu3 }
  0xa6   :  { %v216_v37 = vadd.f32 %v215_v36, %v196_v34  ;;  %v193_v38 = vpop.f32.mrf.mxu0 }
  0xa7   :  { %v212_v40 = vpop.f32.mrf.mxu1 }
  0xa8   :  { %v222_v42 = vadd.f32 %v216_v37, %v28_v35  ;;  %v213_v43 = vadd.f32 %v212_v40, %v193_v38 }
  0xaa   :  { %227 = vst.msk [vmem:[#allocation2 + $0x10] sm:$0xff] %vm21_vm0, %v222_v42  ;;  %v221_v45 = vadd.f32 %v213_v43, %v27_v39 }
  0xab   :  { %v232_v46 = vld [vmem:[#allocation2] sm:$0xff] }
  0xac   :  { %v240_v47 = vmul.f32 %v386_v41, %v232_v46  ;;  %226 = vst.msk [vmem:[#allocation2 + $0x8] sm:$0xff] %vm21_vm0, %v221_v45  ;;  %v198_v48 = vpop.f32.mrf.mxu2 }
  0xad   :  { %v217_v50 = vpop.f32.mrf.mxu3 }
  0xae   :  { %v248_v51 = vadd.f32 %v387_v44, %v240_v47  ;;  %v218_v52 = vadd.f32 %v217_v50, %v198_v48 }
  0xb0   :  { %v252_v53 = vmax.f32 %v248_v51, 0.0  ;;  %v223_v54 = vadd.f32 %v218_v52, %v29_v49 }
  0xb1   :  { %v234_v55 = vld [vmem:[#allocation2 + $0x10] sm:$0xff] }
  0xb2   :  { %v256_v56 = vpack.c.bf16 %v252_v53, %v252_v53  ;;  %v242_v57 = vmul.f32 %v386_v41, %v234_v55  ;;  %228 = vst.msk [vmem:[#allocation2 + $0x18] sm:$0xff] %vm21_vm0, %v223_v54 }
  0xb3   :  { %v233_v58 = vld [vmem:[#allocation2 + $0x8] sm:$0xff] }
  0xb4   :  { %261 = vst.msk [vmem:[%s520_s4] sm:$0xf] %vm260_vm1, %v256_v56  ;;  %v250_v59 = vadd.f32 %v387_v44, %v242_v57  ;;  %v241_v60 = vmul.f32 %v386_v41, %v233_v58 }
  0xb6   :  { %v254_v61 = vmax.f32 %v250_v59, 0.0  ;;  %v249_v62 = vadd.f32 %v387_v44, %v241_v60 }
  0xb8   :  { %v258_v63 = vpack.c.bf16 %v254_v61, %v254_v61  ;;  %v253_v0 = vmax.f32 %v249_v62, 0.0 }
  0xb9   :  { %v235_v1 = vld [vmem:[#allocation2 + $0x18] sm:$0xff] }
  0xba   :  { %263 = vst.msk [vmem:[%s520_s4 + $0x8] sm:$0xf] %vm260_vm1, %v258_v63  ;;  %v257_v2 = vpack.c.bf16 %v253_v0, %v253_v0  ;;  %v243_v3 = vmul.f32 %v386_v41, %v235_v1 }
  0xbc   :  { %262 = vst.msk [vmem:[%s520_s4 + $0x4] sm:$0xf] %vm260_vm1, %v257_v2  ;;  %v251_v4 = vadd.f32 %v387_v44, %v243_v3 }
  0xbe   :  { %v255_v5 = vmax.f32 %v251_v4, 0.0 }
  0xc0   :  { %v259_v6 = vpack.c.bf16 %v255_v5, %v255_v5 }
  0xc2   :  { %264 = vst.msk [vmem:[%s520_s4 + $0xc] sm:$0xf] %vm260_vm1, %v259_v6 }

// kernel: vqvae_forward.7
= control target key start
LH: loop header
LB: loop body
LE: loop exit
PB: predicated region body
PF: predicated region fallthrough
CT: control target
= control target key end

     0   :  { %vm67_vm0 = vcmask 261120   ;;  %v198_v36 = vlaneseq  ;;  %vm459_vm15 = vcmask 257024   ;;  %s786_s1 = inlined_call_operand.vmem [shape: bf16[32,128], index: 1, kind: input, shape index: {}]   ;;  %s787_s3 = inlined_call_operand.vmem [shape: bf16[128,128], index: 3, kind: input, shape index: {}]   ;;  %s788_s0 = inlined_call_operand.vmem [shape: bf16[32,32], index: 0, kind: input, shape index: {}]   ;;  %s789_s2 = inlined_call_operand.vmem [shape: f32[1,128], index: 2, kind: input, shape index: {}]   ;;  %s790_s4 = inlined_call_operand.vmem [shape: f32[1,128], index: 4, kind: input, shape index: {}]   ;;  %s791_s5 = inlined_call_operand.vmem [shape: bf16[128,32], index: 5, kind: input, shape index: {}]   ;;  %s792_s9 = inlined_call_operand.vmem [shape: s32[1,32,128], index: 9, kind: output, shape index: {1}]   ;;  %s793_s6 = inlined_call_operand.vmem [shape: f32[1,32], index: 6, kind: input, shape index: {}]   ;;  %s794_s7 = inlined_call_operand.vmem [shape: f32[1,32], index: 7, kind: input, shape index: {}]   ;;  %s795_s8 = inlined_call_operand.vmem [shape: bf16[32,32], index: 8, kind: output, shape index: {0}]   ;;  %s796_s10 = inlined_call_operand.vmem [shape: f32[1,8,128], index: 10, kind: output, shape index: {2}]  }
   0x1   :  { %v569_v0 = vld [vmem:[%s786_s1 + $0x8] sm:$0xff]  ;;  %v577_v1 = vld [vmem:[%s787_s3 + $0x38] sm:$0xff]  ;;  %v568_v2 = vld [vmem:[%s786_s1] sm:$0xff] }
   0x2   :  { %80 = vmatpush.bf16.msra.mxu2 %v569_v0  ;;  %159 = vmatpush.bf16.xpose.msra.mxu0 %v577_v1  ;;  %v566_v3 = vld [vmem:[%s788_s0] sm:$0xff]  ;;  %v576_v4 = vld [vmem:[%s787_s3 + $0x30] sm:$0xff]  ;;  %v575_v5 = vld [vmem:[%s787_s3 + $0x28] sm:$0xff]  ;;  %v711_v37 = vand.u32 127, %v198_v36 }
   0x3   :  { %586 = vmatpush.bf16.xpose.msra.mxu1 %v577_v1  ;;  %v574_v6 = vld [vmem:[%s787_s3 + $0x20] sm:$0xff]  ;;  %v567_v7 = vld [vmem:[%s788_s0 + $0x8] sm:$0xff]  ;;  %v573_v8 = vld [vmem:[%s787_s3 + $0x18] sm:$0xff] }
   0x4   :  { %v572_v9 = vld [vmem:[%s787_s3 + $0x10] sm:$0xff]  ;;  %v571_v10 = vld [vmem:[%s787_s3 + $0x8] sm:$0xff]  ;;  %v570_v11 = vld [vmem:[%s787_s3] sm:$0xff] }
   0x5   :  { %v595_v13 = vld [vmem:[%s789_s2] ss:$0 sm:$0xff]  ;;  %v580_v36 = vld [vmem:[%s791_s5 + $0x10] sm:$0xff] }
   0x6   :  { %81 = vmatpush.bf16.msra.mxu2 %v568_v2  ;;  %v596_v23 = vld [vmem:[%s790_s4] ss:$0 sm:$0xff] }
   0x9   :  { %492 = vmatmul.msk.bf16.vlgmr.msra.gmra.mxu2 %vm67_vm0, %v566_v3 }
   0xa   :  { %278 = vmatpush.bf16.msrb.mxu2 %v577_v1  ;;  %160 = vmatpush.bf16.xpose.msra.mxu0 %v576_v4 }
   0xb   :  { %587 = vmatpush.bf16.xpose.msra.mxu1 %v576_v4 }
   0xe   :  { %279 = vmatpush.bf16.msrb.mxu2 %v576_v4 }
  0x12   :  { %280 = vmatpush.bf16.msrb.mxu2 %v575_v5  ;;  %161 = vmatpush.bf16.xpose.msra.mxu0 %v575_v5 }
  0x13   :  { %588 = vmatpush.bf16.xpose.msra.mxu1 %v575_v5 }
  0x16   :  { %281 = vmatpush.bf16.msrb.mxu2 %v574_v6 }
  0x19   :  { %493 = vmatmul.msk.bf16.gmra.mxu2 %vm67_vm0, %v567_v7  ;;  %v585_v7 = vld [vmem:[%s791_s5 + $0x38] sm:$0xff] }
  0x1a   :  { %282 = vmatpush.bf16.msrb.mxu2 %v573_v8  ;;  %162 = vmatpush.bf16.xpose.msra.mxu0 %v574_v6 }
  0x1b   :  { %589 = vmatpush.bf16.xpose.msra.mxu1 %v574_v6  ;;  %420 = vmatpush.bf16.msra.mxu3 %v585_v7 }
  0x1e   :  { %283 = vmatpush.bf16.msrb.mxu2 %v572_v9 }
  0x22   :  { %284 = vmatpush.bf16.msrb.mxu2 %v571_v10  ;;  %163 = vmatpush.bf16.xpose.msra.mxu0 %v573_v8 }
  0x23   :  { %590 = vmatpush.bf16.xpose.msra.mxu1 %v573_v8 }
  0x26   :  { %285 = vmatpush.bf16.msrb.mxu2 %v570_v11 }
  0x2a   :  { %164 = vmatpush.bf16.xpose.msra.mxu0 %v572_v9 }
  0x2b   :  { %591 = vmatpush.bf16.xpose.msra.mxu1 %v572_v9 }
  0x32   :  { %165 = vmatpush.bf16.xpose.msra.mxu0 %v571_v10 }
  0x33   :  { %592 = vmatpush.bf16.xpose.msra.mxu1 %v571_v10 }
  0x3a   :  { %166 = vmatpush.bf16.xpose.msra.mxu0 %v570_v11 }
  0x3b   :  { %593 = vmatpush.bf16.xpose.msra.mxu1 %v570_v11  ;;  %v584_v11 = vld [vmem:[%s791_s5 + $0x30] sm:$0xff] }
  0x3c   :  { %421 = vmatpush.bf16.msra.mxu3 %v584_v11 }
  0x8c   :  { %v83_v12 = vpop.f32.mrf.mxu2 }
  0x8d   :  { %v696_v15 = vadd.f32 %v595_v13, %v83_v12 }
  0x94   :  { %v85_v14 = vpop.f32.mrf.mxu2 }
  0x95   :  { %v698_v16 = vadd.f32 %v595_v13, %v85_v14  ;;  %v583_v14 = vld [vmem:[%s791_s5 + $0x28] sm:$0xff] }
  0x96   :  { %422 = vmatpush.bf16.msra.mxu3 %v583_v14 }
  0x97   :  { %v93_v17 = vpack.c.bf16 %v698_v16, %v696_v15 }
  0x99   :  { %167 = vmatmul.bf16.vlgmr.msra.gmra.mxu0 %v93_v17 }
  0x9c   :  { %v88_v18 = vpop.f32.mrf.mxu2 }
  0x9d   :  { %v702_v20 = vadd.f32 %v595_v13, %v88_v18 }
  0xa4   :  { %v90_v19 = vpop.f32.mrf.mxu2 }
  0xa5   :  { %v704_v21 = vadd.f32 %v595_v13, %v90_v19 }
  0xa7   :  { %v94_v22 = vpack.c.bf16 %v704_v21, %v702_v20 }
  0xa9   :  { %172 = vmatmul.bf16.vlgmr.msra.gmra.mxu1 %v94_v22  ;;  %v582_v22 = vld [vmem:[%s791_s5 + $0x20] sm:$0xff] }
  0xaa   :  { %423 = vmatpush.bf16.msra.mxu3 %v582_v22 }
 0x116   :  { %v168_v24 = vpop.f32.mrf.mxu0 }
 0x117   :  { %v179_v25 = vmul.f32 2.0, %v168_v24 }
 0x119   :  { %v186_v26 = vsub.f32 %v596_v23, %v179_v25  ;;  %v581_v25 = vld [vmem:[%s791_s5 + $0x18] sm:$0xff] }
 0x11a   :  { %424 = vmatpush.bf16.msra.mxu3 %v581_v25 }
 0x11b   :  { %190 = vmin.xlane.f32.xlu0 %v186_v26 }
 0x11e   :  { %v170_v27 = vpop.f32.mrf.mxu0  ;;  %425 = vmatpush.bf16.msra.mxu3 %v580_v36 }
 0x11f   :  { %v180_v28 = vmul.f32 2.0, %v170_v27 }
 0x121   :  { %v187_v29 = vsub.f32 %v596_v23, %v180_v28 }
 0x123   :  { %192 = vmin.xlane.f32.xlu0 %v187_v29 }
 0x126   :  { %v173_v30 = vpop.f32.mrf.mxu1 }
 0x127   :  { %v181_v31 = vmul.f32 2.0, %v173_v30 }
 0x129   :  { %v188_v32 = vsub.f32 %v596_v23, %v181_v31 }
 0x12b   :  { %194 = vmin.xlane.f32.xlu1 %v188_v32 }
 0x12e   :  { %v175_v33 = vpop.f32.mrf.mxu1 }
 0x12f   :  { %v182_v34 = vmul.f32 2.0, %v175_v33 }
 0x131   :  { %v189_v35 = vsub.f32 %v596_v23, %v182_v34 }
 0x133   :  { %196 = vmin.xlane.f32.xlu1 %v189_v35 }
 0x18e   :  { %v191_v38 = vpop.xlane.xlu0 %190 }
 0x18f   :  { %vm200_vm1 = vcmp.le.f32.partialorder %v186_v26, %v191_v38  ;;  %v599_v26 = vmov 1.0|1.0   ;;  %v579_v38 = vld [vmem:[%s791_s5 + $0x8] sm:$0xff] }
 0x190   :  { %v204_v39 = vsel %vm200_vm1, %v711_v37, 128  ;;  %426 = vmatpush.bf16.msra.mxu3 %v579_v38 }
 0x191   :  { %v209_v40 = vshra.s32 %v204_v39, 16  ;;  %v208_v54 = vand.u32 65535, %v204_v39  ;;  %v578_v39 = vld [vmem:[%s791_s5] sm:$0xff] }
 0x193   :  { %v211_v41 = vcvt.s32.f32 %v209_v40  ;;  %v210_v56 = vcvt.s32.f32 %v208_v54 }
 0x194   :  { %427 = vmatpush.bf16.msra.mxu3 %v578_v39 }
 0x195   :  { %212 = vmin.xlane.f32.xlu2 %v211_v41 }
 0x196   :  { %v193_v42 = vpop.xlane.xlu0 %192 }
 0x197   :  { %vm201_vm2 = vcmp.le.f32.partialorder %v187_v29, %v193_v42 }
 0x198   :  { %v205_v43 = vsel %vm201_vm2, %v711_v37, 128 }
 0x199   :  { %v223_v44 = vshra.s32 %v205_v43, 16  ;;  %v222_v58 = vand.u32 65535, %v205_v43 }
 0x19b   :  { %v225_v45 = vcvt.s32.f32 %v223_v44  ;;  %v224_v60 = vcvt.s32.f32 %v222_v58 }
 0x19d   :  { %226 = vmin.xlane.f32.xlu2 %v225_v45 }
 0x19e   :  { %v195_v46 = vpop.xlane.xlu1 %194 }
 0x19f   :  { %vm202_vm3 = vcmp.le.f32.partialorder %v188_v32, %v195_v46 }
 0x1a0   :  { %v206_v47 = vsel %vm202_vm3, %v711_v37, 128 }
 0x1a1   :  { %v237_v48 = vshra.s32 %v206_v47, 16  ;;  %v236_v62 = vand.u32 65535, %v206_v47 }
 0x1a3   :  { %v239_v49 = vcvt.s32.f32 %v237_v48  ;;  %v238_v0 = vcvt.s32.f32 %v236_v62 }
 0x1a5   :  { %240 = vmin.xlane.f32.xlu0 %v239_v49 }
 0x1a6   :  { %v197_v50 = vpop.xlane.xlu1 %196 }
 0x1a7   :  { %vm203_vm4 = vcmp.le.f32.partialorder %v189_v35, %v197_v50 }
 0x1a8   :  { %v207_v51 = vsel %vm203_vm4, %v711_v37, 128 }
 0x1a9   :  { %v251_v52 = vshra.s32 %v207_v51, 16  ;;  %v250_v2 = vand.u32 65535, %v207_v51 }
 0x1ab   :  { %v253_v53 = vcvt.s32.f32 %v251_v52  ;;  %v252_v4 = vcvt.s32.f32 %v250_v2 }
 0x1ad   :  { %254 = vmin.xlane.f32.xlu1 %v253_v53 }
 0x208   :  { %v213_v55 = vpop.xlane.xlu2 %212 }
 0x209   :  { %vm214_vm5 = vcmp.eq.f32.partialorder %v211_v41, %v213_v55  ;;  %v219_v6 = vcvt.f32.s32 %v213_v55 }
 0x20a   :  { %v215_v57 = vsel %vm214_vm5, %v210_v56, inf }
 0x20b   :  { %216 = vmin.xlane.f32.xlu2 %v215_v57  ;;  %v220_v9 = vshll.u32 %v219_v6, 16 }
 0x210   :  { %v227_v59 = vpop.xlane.xlu2 %226 }
 0x211   :  { %vm228_vm6 = vcmp.eq.f32.partialorder %v225_v45, %v227_v59  ;;  %v233_v13 = vcvt.f32.s32 %v227_v59 }
 0x212   :  { %v229_v61 = vsel %vm228_vm6, %v224_v60, inf }
 0x213   :  { %230 = vmin.xlane.f32.xlu0 %v229_v61  ;;  %v234_v18 = vshll.u32 %v233_v13, 16 }
 0x218   :  { %v241_v63 = vpop.xlane.xlu0 %240 }
 0x219   :  { %vm242_vm7 = vcmp.eq.f32.partialorder %v239_v49, %v241_v63  ;;  %v247_v24 = vcvt.f32.s32 %v241_v63 }
 0x21a   :  { %v243_v1 = vsel %vm242_vm7, %v238_v0, inf }
 0x21b   :  { %244 = vmin.xlane.f32.xlu1 %v243_v1  ;;  %v248_v28 = vshll.u32 %v247_v24, 16 }
 0x220   :  { %v255_v3 = vpop.xlane.xlu1 %254 }
 0x221   :  { %vm256_vm8 = vcmp.eq.f32.partialorder %v253_v53, %v255_v3  ;;  %v261_v31 = vcvt.f32.s32 %v255_v3 }
 0x222   :  { %v257_v5 = vsel %vm256_vm8, %v252_v4, inf }
 0x223   :  { %258 = vmin.xlane.f32.xlu2 %v257_v5  ;;  %v262_v33 = vshll.u32 %v261_v31, 16 }
 0x27e   :  { %v217_v8 = vpop.xlane.xlu2 %216 }
 0x27f   :  { %v218_v10 = vcvt.f32.s32 %v217_v8 }
 0x281   :  { %v221_v12 = vadd.s32 %v220_v9, %v218_v10 }
 0x283   :  { %297 = vst [vmem:[%s792_s9] sm:$0xff] %v221_v12  ;;  %vm264_vm9 = vcmp.eq.s32.totalorder %v711_v37, %v221_v12 }
 0x286   :  { %v231_v17 = vpop.xlane.xlu0 %230 }
 0x287   :  { %v232_v19 = vcvt.f32.s32 %v231_v17 }
 0x289   :  { %v235_v23 = vadd.s32 %v234_v18, %v232_v19 }
 0x28b   :  { %298 = vst [vmem:[%s792_s9 + $0x8] sm:$0xff] %v235_v23  ;;  %vm265_vm10 = vcmp.eq.s32.totalorder %v711_v37, %v235_v23 }
 0x28c   :  { %vm530_vm11 = vmpackc.low %vm265_vm10, %vm264_vm9 }
 0x28d   :  { %531 = vmatmul.msk.bf16.vlgmr.msrb.gmra.mxu2 %vm530_vm11, %v599_v26 }
 0x28e   :  { %v245_v27 = vpop.xlane.xlu1 %244 }
 0x28f   :  { %v246_v29 = vcvt.f32.s32 %v245_v27 }
 0x291   :  { %v249_v30 = vadd.s32 %v248_v28, %v246_v29 }
 0x293   :  { %299 = vst [vmem:[%s792_s9 + $0x10] sm:$0xff] %v249_v30  ;;  %vm266_vm12 = vcmp.eq.s32.totalorder %v711_v37, %v249_v30 }
 0x296   :  { %v259_v32 = vpop.xlane.xlu2 %258 }
 0x297   :  { %v260_v34 = vcvt.f32.s32 %v259_v32 }
 0x299   :  { %v263_v35 = vadd.s32 %v262_v33, %v260_v34 }
 0x29b   :  { %300 = vst [vmem:[%s792_s9 + $0x18] sm:$0xff] %v263_v35  ;;  %vm267_vm13 = vcmp.eq.s32.totalorder %v711_v37, %v263_v35 }
 0x29c   :  { %vm532_vm14 = vmpackc.low %vm267_vm13, %vm266_vm12 }
 0x29d   :  { %533 = vmatmul.msk.bf16.gmra.mxu2 %vm532_vm14, %v599_v26 }
 0x310   :  { %v287_v40 = vpop.f32.mrf.mxu2 }
 0x311   :  { %v324_v37 = vsub.f32 %v287_v40, %v696_v15 }
 0x313   :  { %v332_v41 = vmul.f32 %v324_v37, %v324_v37 }
 0x315   :  { %336 = vadd.xlane.f32.xlu0 %v332_v41 }
 0x318   :  { %v289_v42 = vpop.f32.mrf.mxu2 }
 0x319   :  { %v325_v43 = vsub.f32 %v289_v42, %v698_v16  ;;  %v354_v44 = vpack.c.bf16 %v289_v42, %v287_v40  ;;  %v597_v16 = vld [vmem:[%s793_s6] ss:$0 sm:$0xff] }
 0x31b   :  { %428 = vmatmul.bf16.vlgmr.msra.gmra.mxu3 %v354_v44  ;;  %v333_v45 = vmul.f32 %v325_v43, %v325_v43 }
 0x31d   :  { %338 = vadd.xlane.f32.xlu1 %v333_v45 }
 0x320   :  { %v292_v46 = vpop.f32.mrf.mxu2 }
 0x321   :  { %v326_v47 = vsub.f32 %v292_v46, %v702_v20  ;;  %v598_v20 = vld [vmem:[%s794_s7] ss:$0 sm:$0xff] }
 0x323   :  { %v334_v48 = vmul.f32 %v326_v47, %v326_v47 }
 0x325   :  { %340 = vadd.xlane.f32.xlu2 %v334_v48 }
 0x328   :  { %v294_v49 = vpop.f32.mrf.mxu2 }
 0x329   :  { %v327_v50 = vsub.f32 %v294_v49, %v704_v21  ;;  %v355_v51 = vpack.c.bf16 %v294_v49, %v292_v46 }
 0x32b   :  { %v335_v52 = vmul.f32 %v327_v50, %v327_v50  ;;  %433 = vmatmul.bf16.gmra.mxu3 %v355_v51 }
 0x32d   :  { %342 = vadd.xlane.f32.xlu0 %v335_v52 }
 0x388   :  { %v337_v15 = vpop.xlane.xlu0 %336 }
 0x390   :  { %v339_v53 = vpop.xlane.xlu1 %338 }
 0x391   :  { %v344_v55 = vadd.f32 %v339_v53, %v337_v15 }
 0x398   :  { %v341_v54 = vpop.xlane.xlu2 %340 }
 0x399   :  { %v345_v57 = vadd.f32 %v344_v55, %v341_v54 }
 0x39e   :  { %v429_v56 = vpop.f32.mrf.mxu3 }
 0x39f   :  { %v443_v58 = vmul.f32 %v597_v16, %v429_v56 }
 0x3a0   :  { %v343_v21 = vpop.xlane.xlu0 %342 }
 0x3a1   :  { %v451_v59 = vadd.f32 %v598_v20, %v443_v58  ;;  %v346_v60 = vadd.f32 %v345_v57, %v343_v21 }
 0x3a3   :  { %v455_v61 = vpack.c.bf16 %v451_v59, %v451_v59  ;;  %v347_v62 = vrot.slane %v346_v60, 4 }
 0x3a5   :  { %460 = vst.msk [vmem:[%s795_s8] sm:$0xf] %vm459_vm15, %v455_v61  ;;  %v348_v63 = vadd.f32 %v347_v62, %v346_v60 }
 0x3a6   :  { %v431_v0 = vpop.f32.mrf.mxu3 }
 0x3a7   :  { %v349_v1 = vrot.slane %v348_v63, 2  ;;  %v444_v2 = vmul.f32 %v597_v16, %v431_v0 }
 0x3a9   :  { %v350_v3 = vadd.f32 %v349_v1, %v348_v63  ;;  %v452_v4 = vadd.f32 %v598_v20, %v444_v2 }
 0x3ab   :  { %v351_v5 = vrot.slane %v350_v3, 1  ;;  %v456_v6 = vpack.c.bf16 %v452_v4, %v452_v4 }
 0x3ad   :  { %v352_v7 = vadd.f32 %v351_v5, %v350_v3  ;;  %461 = vst.msk [vmem:[%s795_s8 + $0x4] sm:$0xf] %vm459_vm15, %v456_v6 }
 0x3ae   :  { %v434_v8 = vpop.f32.mrf.mxu3 }
 0x3af   :  { %353 = vst [vmem:[%s796_s10] sm:$0xff] %v352_v7  ;;  %v445_v9 = vmul.f32 %v597_v16, %v434_v8 }
 0x3b1   :  { %v453_v10 = vadd.f32 %v598_v20, %v445_v9 }
 0x3b3   :  { %v457_v11 = vpack.c.bf16 %v453_v10, %v453_v10 }
 0x3b5   :  { %462 = vst.msk [vmem:[%s795_s8 + $0x8] sm:$0xf] %vm459_vm15, %v457_v11 }
 0x3b6   :  { %v436_v12 = vpop.f32.mrf.mxu3 }
 0x3b7   :  { %v446_v13 = vmul.f32 %v597_v16, %v436_v12 }
 0x3b9   :  { %v454_v14 = vadd.f32 %v598_v20, %v446_v13 }
 0x3bb   :  { %v458_v17 = vpack.c.bf16 %v454_v14, %v454_v14 }
 0x3bd   :  { %463 = vst.msk [vmem:[%s795_s8 + $0xc] sm:$0xf] %vm459_vm15, %v458_v17 }

// kernel: vqvae_forward.8
= control target key start
LH: loop header
LB: loop body
LE: loop exit
PB: predicated region body
PF: predicated region fallthrough
CT: control target
= control target key end

     0   :  { %vm213_vm0 = vcmask 261120   ;;  %vm22_vm1 = vcmask 523264   ;;  %v459_v36 = vmov 0.0   ;;  %vm317_vm2 = vcmask 519168   ;;  %s607_s1 = inlined_call_operand.vmem [shape: bf16[288,64], index: 1, kind: input, shape index: {}]   ;;  %s608_s0 = inlined_call_operand.vmem [shape: bf16[32,288], index: 0, kind: input, shape index: {}]   ;;  %s609_s2 = inlined_call_operand.vmem [shape: f32[1,64], index: 2, kind: input, shape index: {}]   ;;  %s610_s3 = inlined_call_operand.vmem [shape: f32[1,64], index: 3, kind: input, shape index: {}]   ;;  %s611_s4 = inlined_call_operand.vmem [shape: bf16[32,64], index: 4, kind: output, shape index: {}]  }
   0x1   :  { %v437_v0 = vld [vmem:[%s607_s1 + $0x38] sm:$0xff]  ;;  %v436_v2 = vld [vmem:[%s607_s1 + $0x30] sm:$0xff]  ;;  %v447_v4 = vld [vmem:[%s607_s1 + $0x88] sm:$0xff]  ;;  %23 = vst.msk [vmem:[#allocation2] sm:$0xff] %vm22_vm1, %v459_v36 }
   0x2   :  { %v445_v1 = vld [vmem:[%s607_s1 + $0x78] sm:$0xff]  ;;  %220 = vmatpush.bf16.msra.mxu0 %v437_v0  ;;  %v444_v3 = vld [vmem:[%s607_s1 + $0x70] sm:$0xff]  ;;  %448 = vmatpush.bf16.msra.mxu3 %v437_v0  ;;  %v446_v5 = vld [vmem:[%s607_s1 + $0x80] sm:$0xff]  ;;  %24 = vst.msk [vmem:[#allocation2 + $0x8] sm:$0xff] %vm22_vm1, %v459_v36 }
   0x3   :  { %239 = vmatpush.bf16.msra.mxu1 %v445_v1  ;;  %264 = vmatpush.bf16.msra.mxu2 %v447_v4  ;;  %v336_v6 = vld [vmem:[%s608_s0 + $0x8] sm:$0xf]  ;;  %v426_v7 = vld [vmem:[%s608_s0 + $0x10] sm:$0xf0]  ;;  %v434_v11 = vld [vmem:[%s607_s1 + $0x20] sm:$0xff]  ;;  %25 = vst.msk [vmem:[#allocation2 + $0x10] sm:$0xff] %vm22_vm1, %v459_v36 }
   0x4   :  { %v435_v8 = vld [vmem:[%s607_s1 + $0x28] sm:$0xff]  ;;  %v337_v10 = vor.u32 %v426_v7, %v336_v6  ;;  %v442_v12 = vld [vmem:[%s607_s1 + $0x60] sm:$0xff]  ;;  %v433_v13 = vld [vmem:[%s607_s1 + $0x18] sm:$0xff]  ;;  %26 = vst.msk [vmem:[#allocation2 + $0x18] sm:$0xff] %vm22_vm1, %v459_v36 }
   0x5   :  { %v443_v9 = vld [vmem:[%s607_s1 + $0x68] sm:$0xff]  ;;  %v441_v14 = vld [vmem:[%s607_s1 + $0x58] sm:$0xff]  ;;  %v432_v15 = vld [vmem:[%s607_s1 + $0x10] sm:$0xff] }
   0x6   :  { %221 = vmatpush.bf16.msra.mxu0 %v436_v2  ;;  %449 = vmatpush.bf16.msra.mxu3 %v436_v2  ;;  %v440_v16 = vld [vmem:[%s607_s1 + $0x50] sm:$0xff]  ;;  %v348_v17 = vld [vmem:[%s608_s0 + $0x20] sm:$0xf]  ;;  %v429_v18 = vld [vmem:[%s608_s0 + $0x28] sm:$0xf0] }
   0x7   :  { %240 = vmatpush.bf16.msra.mxu1 %v444_v3  ;;  %265 = vmatpush.bf16.msra.mxu2 %v446_v5  ;;  %v431_v19 = vld [vmem:[%s607_s1 + $0x8] sm:$0xff]  ;;  %v349_v21 = vor.u32 %v429_v18, %v348_v17  ;;  %v430_v22 = vld [vmem:[%s607_s1] sm:$0xff]  ;;  %v330_v27 = vld [vmem:[%s608_s0 + $0xc] sm:$0xf0] }
   0x8   :  { %v439_v20 = vld [vmem:[%s607_s1 + $0x48] sm:$0xff]  ;;  %v438_v23 = vld [vmem:[%s607_s1 + $0x40] sm:$0xff]  ;;  %v340_v28 = vld [vmem:[%s608_s0 + $0x18] sm:$0xf] }
   0x9   :  { %v328_v24 = vld [vmem:[%s608_s0] sm:$0xf]  ;;  %v425_v25 = vld [vmem:[%s608_s0 + $0x8] sm:$0xf0]  ;;  %v424_v26 = vld [vmem:[%s608_s0 + $0x4] sm:$0xf] }
   0xa   :  { %222 = vmatpush.bf16.msra.mxu0 %v435_v8  ;;  %450 = vmatpush.bf16.msra.mxu3 %v435_v8  ;;  %v428_v29 = vld [vmem:[%s608_s0 + $0x20] sm:$0xf0]  ;;  %v329_v30 = vor.u32 %v425_v25, %v328_v24  ;;  %v333_v31 = vor.u32 %v424_v26, %v330_v27  ;;  %v427_v33 = vld [vmem:[%s608_s0 + $0x1c] sm:$0xf]  ;;  %v342_v34 = vld [vmem:[%s608_s0 + $0x24] sm:$0xf0] }
   0xb   :  { %241 = vmatpush.bf16.msra.mxu1 %v443_v9  ;;  %422 = vmatmul.msk.bf16.vlgmr.msra.gmra.mxu2 %vm213_vm0, %v337_v10  ;;  %v341_v32 = vor.u32 %v428_v29, %v340_v28  ;;  %v345_v35 = vor.u32 %v427_v33, %v342_v34  ;;  %v27_v41 = vld [vmem:[#allocation2] sm:$0xff]  ;;  %v28_v48 = vld [vmem:[#allocation2 + $0x8] sm:$0xff]  ;;  %v29_v60 = vld [vmem:[#allocation2 + $0x10] sm:$0xff] }
   0xc   :  { %v457_v49 = vld [vmem:[%s609_s2] ss:$0 sm:$0xff]  ;;  %v30_v8 = vld [vmem:[#allocation2 + $0x18] sm:$0xff] }
   0xd   :  { %v458_v51 = vld [vmem:[%s610_s3] ss:$0 sm:$0xff] }
   0xe   :  { %223 = vmatpush.bf16.msra.mxu0 %v434_v11  ;;  %451 = vmatpush.bf16.msra.mxu3 %v434_v11 }
   0xf   :  { %242 = vmatpush.bf16.msra.mxu1 %v442_v12 }
  0x12   :  { %224 = vmatpush.bf16.msra.mxu0 %v433_v13  ;;  %452 = vmatpush.bf16.msra.mxu3 %v433_v13 }
  0x13   :  { %243 = vmatpush.bf16.msra.mxu1 %v441_v14 }
  0x16   :  { %225 = vmatpush.bf16.msra.mxu0 %v432_v15  ;;  %453 = vmatpush.bf16.msra.mxu3 %v432_v15 }
  0x17   :  { %244 = vmatpush.bf16.msra.mxu1 %v440_v16 }
  0x1a   :  { %226 = vmatpush.bf16.msra.mxu0 %v431_v19  ;;  %454 = vmatpush.bf16.msra.mxu3 %v431_v19 }
  0x1b   :  { %245 = vmatpush.bf16.msra.mxu1 %v439_v20  ;;  %423 = vmatmul.msk.bf16.gmra.mxu2 %vm213_vm0, %v349_v21 }
  0x1e   :  { %227 = vmatpush.bf16.msra.mxu0 %v430_v22  ;;  %455 = vmatpush.bf16.msra.mxu3 %v430_v22 }
  0x1f   :  { %246 = vmatpush.bf16.msra.mxu1 %v438_v23 }
  0x21   :  { %228 = vmatmul.bf16.vlgmr.msra.gmra.mxu0 %v329_v30  ;;  %233 = vmatmul.bf16.vlgmr.msra.gmra.mxu3 %v341_v32 }
  0x22   :  { %247 = vmatmul.bf16.vlgmr.msra.gmra.mxu1 %v333_v31 }
  0x32   :  { %252 = vmatmul.bf16.gmra.mxu1 %v345_v35 }
  0x8e   :  { %v267_v37 = vpop.f32.mrf.mxu2 }
  0x96   :  { %v269_v44 = vpop.f32.mrf.mxu2 }
  0x9e   :  { %v229_v38 = vpop.f32.mrf.mxu0  ;;  %v272_v56 = vpop.f32.mrf.mxu2 }
  0x9f   :  { %v248_v39 = vpop.f32.mrf.mxu1 }
  0xa0   :  { %v249_v40 = vadd.f32 %v248_v39, %v229_v38 }
  0xa2   :  { %v268_v42 = vadd.f32 %v267_v37, %v249_v40 }
  0xa4   :  { %v277_v43 = vadd.f32 %v268_v42, %v27_v41  ;;  %v234_v54 = vpop.f32.mrf.mxu3 }
  0xa6   :  { %282 = vst.msk [vmem:[#allocation2] sm:$0xff] %vm22_vm1, %v277_v43  ;;  %v231_v45 = vpop.f32.mrf.mxu0  ;;  %v274_v7 = vpop.f32.mrf.mxu2 }
  0xa7   :  { %v250_v46 = vpop.f32.mrf.mxu1 }
  0xa8   :  { %v251_v47 = vadd.f32 %v250_v46, %v231_v45 }
  0xaa   :  { %v270_v50 = vadd.f32 %v269_v44, %v251_v47 }
  0xac   :  { %v278_v52 = vadd.f32 %v270_v50, %v28_v48  ;;  %v236_v3 = vpop.f32.mrf.mxu3 }
  0xad   :  { %v289_v53 = vld [vmem:[#allocation2] sm:$0xff] }
  0xae   :  { %v297_v55 = vmul.f32 %v457_v49, %v289_v53  ;;  %283 = vst.msk [vmem:[#allocation2 + $0x8] sm:$0xff] %vm22_vm1, %v278_v52 }
  0xaf   :  { %v253_v57 = vpop.f32.mrf.mxu1 }
  0xb0   :  { %v305_v58 = vadd.f32 %v458_v51, %v297_v55  ;;  %v254_v59 = vadd.f32 %v253_v57, %v234_v54 }
  0xb2   :  { %v309_v61 = vmax.f32 %v305_v58, 0.0  ;;  %v273_v62 = vadd.f32 %v272_v56, %v254_v59 }
  0xb4   :  { %v313_v63 = vpack.c.bf16 %v309_v61, %v309_v61  ;;  %v279_v0 = vadd.f32 %v273_v62, %v29_v60 }
  0xb5   :  { %v290_v1 = vld [vmem:[#allocation2 + $0x8] sm:$0xff] }
  0xb6   :  { %318 = vst.msk [vmem:[%s611_s4] sm:$0xf] %vm317_vm2, %v313_v63  ;;  %v298_v2 = vmul.f32 %v457_v49, %v290_v1 }
  0xb7   :  { %284 = vst.msk [vmem:[#allocation2 + $0x10] sm:$0xff] %vm22_vm1, %v279_v0  ;;  %v255_v4 = vpop.f32.mrf.mxu1 }
  0xb8   :  { %v306_v5 = vadd.f32 %v458_v51, %v298_v2  ;;  %v256_v6 = vadd.f32 %v255_v4, %v236_v3 }
  0xba   :  { %v310_v9 = vmax.f32 %v306_v5, 0.0  ;;  %v275_v10 = vadd.f32 %v274_v7, %v256_v6 }
  0xbc   :  { %v314_v11 = vpack.c.bf16 %v310_v9, %v310_v9  ;;  %v280_v12 = vadd.f32 %v275_v10, %v30_v8 }
  0xbe   :  { %319 = vst.msk [vmem:[%s611_s4 + $0x4] sm:$0xf] %vm317_vm2, %v314_v11  ;;  %v291_v13 = vld [vmem:[#allocation2 + $0x10] sm:$0xff] }
  0xbf   :  { %v299_v14 = vmul.f32 %v457_v49, %v291_v13  ;;  %285 = vst.msk [vmem:[#allocation2 + $0x18] sm:$0xff] %vm22_vm1, %v280_v12 }
  0xc1   :  { %v307_v15 = vadd.f32 %v458_v51, %v299_v14 }
  0xc3   :  { %v311_v16 = vmax.f32 %v307_v15, 0.0 }
  0xc5   :  { %v315_v17 = vpack.c.bf16 %v311_v16, %v311_v16 }
  0xc6   :  { %v292_v18 = vld [vmem:[#allocation2 + $0x18] sm:$0xff] }
  0xc7   :  { %320 = vst.msk [vmem:[%s611_s4 + $0x8] sm:$0xf] %vm317_vm2, %v315_v17  ;;  %v300_v19 = vmul.f32 %v457_v49, %v292_v18 }
  0xc9   :  { %v308_v20 = vadd.f32 %v458_v51, %v300_v19 }
  0xcb   :  { %v312_v21 = vmax.f32 %v308_v20, 0.0 }
  0xcd   :  { %v316_v22 = vpack.c.bf16 %v312_v21, %v312_v21 }
  0xcf   :  { %321 = vst.msk [vmem:[%s611_s4 + $0xc] sm:$0xf] %vm317_vm2, %v316_v22 }

// kernel: squeeze.3
= control target key start
LH: loop header
LB: loop body
LE: loop exit
PB: predicated region body
PF: predicated region fallthrough
CT: control target
= control target key end

     0   :  { %s142_s0 = inlined_call_operand.vmem [shape: s32[32], index: 0, kind: input, shape index: {}]   ;;  %s143_s1 = inlined_call_operand.hbm [shape: s32[2,4,4], index: 1, kind: output, shape index: {}]  }
   0x1   :  { %v5_v0 = vld [vmem:[%s142_s0] sm:$0x1] }
   0x2   :  { %6 = vst [vmem:[#allocation3] sm:$0x1] %v5_v0 }
   0x3   :  { %2 = vsyncpa [#allocation1], 0  ;;  %s110_s0 = smov 124   ;;  %s111_s8 = smov 116   ;;  %vm8_vm0 = vcmask 31744  }
   0x4   :  { %s112_s9 = smov 108   ;;  %s113_s10 = smov 120  }
   0x5   :  { %s114_s11 = smov 112   ;;  %s115_s12 = smov 104  }
   0x6   :  { %s116_s13 = smov 100   ;;  %s117_s14 = smov [#allocation0]  }
   0x7   :  { %s67_s15 = sshll.u32 %s117_s14, 4  ;;  %s69_s1 = sshll.u32 %s143_s1, 4  ;;  %s68_s15 = int_to_ptr.vmem [resolvable:$true] %s67_s15  ;;  %s70_s1 = int_to_ptr.hbm [resolvable:$true] %s69_s1 }
   0x9   :  { %v10_v1 = vld [vmem:[#allocation3] sm:$0x1]  }
   0xa   :  { %v22_v2 = vld [vmem:[#allocation3] sm:$0x1]   ;;  %11 = vrot.lane.b32.xlu0 %v10_v1, %s110_s0 }
   0xb   :  { %23 = vrot.lane.b32.xlu1 %v22_v2, %s111_s8  ;;  %v34_v3 = vld [vmem:[#allocation3] sm:$0x1]  }
   0xc   :  { %35 = vrot.lane.b32.xlu2 %v34_v3, %s112_s9  ;;  %v16_v4 = vld [vmem:[#allocation3] sm:$0x1]  }
   0xd   :  { %v28_v5 = vld [vmem:[#allocation3] sm:$0x1]  }
   0xe   :  { %v40_v6 = vld [vmem:[#allocation3] sm:$0x1]  }
   0xf   :  { %v46_v7 = vld [vmem:[#allocation3] sm:$0x1]  }
  0x10   :  { %v7_v8 = vld [vmem:[#allocation3] sm:$0x1]  }
  0x11   :  { %9 = vst.msk [vmem:[#allocation2] sm:$0x1] %vm8_vm0, %v7_v8  }
  0x12   :  { %17 = vrot.lane.b32.xlu0 %v16_v4, %s113_s10 }
  0x13   :  { %29 = vrot.lane.b32.xlu1 %v28_v5, %s114_s11 }
  0x14   :  { %41 = vrot.lane.b32.xlu2 %v40_v6, %s115_s12 }
  0x1a   :  { %47 = vrot.lane.b32.xlu0 %v46_v7, %s116_s13 }
  0x66   :  { %v36_v9 = vpop.permute.xlu2 %35  }
  0x67   :  { %39 = vst.msk [vmem:[#allocation2 + $0x9] sm:$0x1] %vm8_vm0, %v36_v9  }
  0x6e   :  { %v42_v10 = vpop.permute.xlu2 %41  }
  0x6f   :  { %45 = vst.msk [vmem:[#allocation2 + $0xa] sm:$0x1] %vm8_vm0, %v42_v10  }
  0x7c   :  { %v12_v11 = vpop.permute.xlu0 %11  }
  0x7d   :  { %v24_v12 = vpop.permute.xlu1 %23   ;;  %15 = vst.msk [vmem:[#allocation2 + $0x1] sm:$0x1] %vm8_vm0, %v12_v11  }
  0x7e   :  { %27 = vst.msk [vmem:[#allocation2 + $0x3] sm:$0x1] %vm8_vm0, %v24_v12  }
  0x84   :  { %v18_v13 = vpop.permute.xlu0 %17  }
  0x85   :  { %v30_v14 = vpop.permute.xlu1 %29   ;;  %21 = vst.msk [vmem:[#allocation2 + $0x2] sm:$0x1] %vm8_vm0, %v18_v13  }
  0x86   :  { %33 = vst.msk [vmem:[#allocation2 + $0x8] sm:$0x1] %vm8_vm0, %v30_v14  }
  0x8c   :  { %v48_v15 = vpop.permute.xlu0 %47   ;;  %v54_v16 = vld [vmem:[#allocation2] sm:$0xf] }
  0x8d   :  { %51 = vst.msk [vmem:[#allocation2 + $0xb] sm:$0x1] %vm8_vm0, %v48_v15  }
  0x8e   :  { %57 = vst [vmem:[#allocation0] sm:$0xf] %v54_v16 }
  0x94   :  { %v59_v17 = vld [vmem:[#allocation2 + $0x8] sm:$0xf] }
  0x95   :  { %63 = vst [vmem:[#allocation0 + $0x4] sm:$0xf] %v59_v17 }
  0x96   :  { %72 = dma.vmem_to_hbm [thread:$0]  %s68_s15, 128, %s70_s1, [#allocation1]  }
  0x97   :  { %108 = dma.done.wait [#allocation1], 128  }
  0x98   :  { %109 = vsyncadd [#allocation1], 4294967168 }
  0x99   :  { %75 = vsyncpa [#allocation1], 1 }

// kernel: vqvae_forward.9
= control target key start
LH: loop header
LB: loop body
LE: loop exit
PB: predicated region body
PF: predicated region fallthrough
CT: control target
= control target key end

     0   :  { %vm215_vm0 = vcmask 130048   ;;  %vm22_vm1 = vcmask 97280   ;;  %v643_v57 = vmov 0.0   ;;  %s953_s1 = inlined_call_operand.vmem [shape: bf16[144,12], index: 1, kind: input, shape index: {}]   ;;  %s954_s0 = inlined_call_operand.vmem [shape: bf16[128,144], index: 0, kind: input, shape index: {}]   ;;  %s955_s2 = inlined_call_operand.vmem [shape: f32[1,12], index: 2, kind: input, shape index: {}]   ;;  %s956_s3 = inlined_call_operand.vmem [shape: f32[1,12], index: 3, kind: input, shape index: {}]   ;;  %s957_s4 = inlined_call_operand.vmem [shape: f32[128,12], index: 4, kind: output, shape index: {}]  }
   0x1   :  { %v597_v0 = vld [vmem:[%s953_s1 + $0x38] sm:$0xff]  ;;  %v598_v1 = vld [vmem:[%s953_s1 + $0x40] sm:$0xff]  ;;  %v470_v3 = vld [vmem:[%s954_s0 + $0x8] sm:$0xf0]  ;;  %23 = vst.msk [vmem:[#allocation2] sm:$0xff] %vm22_vm1, %v643_v57 }
   0x2   :  { %v574_v2 = vld [vmem:[%s954_s0 + $0x4] sm:$0xf]  ;;  %240 = vmatpush.bf16.msra.mxu0 %v597_v0  ;;  %599 = vmatpush.bf16.msra.mxu2 %v597_v0  ;;  %v596_v5 = vld [vmem:[%s953_s1 + $0x30] sm:$0xff]  ;;  %v595_v6 = vld [vmem:[%s953_s1 + $0x28] sm:$0xff]  ;;  %24 = vst.msk [vmem:[#allocation2 + $0x8] sm:$0xff] %vm22_vm1, %v643_v57 }
   0x3   :  { %v473_v4 = vor.u32 %v574_v2, %v470_v3  ;;  %296 = vmatpush.bf16.msra.mxu1 %v598_v1  ;;  %607 = vmatpush.bf16.msra.mxu3 %v598_v1  ;;  %v584_v7 = vld [vmem:[%s954_s0 + $0x54] sm:$0xf]  ;;  %v510_v8 = vld [vmem:[%s954_s0 + $0x58] sm:$0xf0]  ;;  %v594_v10 = vld [vmem:[%s953_s1 + $0x20] sm:$0xff]  ;;  %25 = vst.msk [vmem:[#allocation2 + $0x10] sm:$0xff] %vm22_vm1, %v643_v57 }
   0x4   :  { %v513_v9 = vor.u32 %v584_v7, %v510_v8  ;;  %v593_v11 = vld [vmem:[%s953_s1 + $0x18] sm:$0xff]  ;;  %v576_v12 = vld [vmem:[%s954_s0 + $0x14] sm:$0xf]  ;;  %v591_v16 = vld [vmem:[%s953_s1 + $0x8] sm:$0xff]  ;;  %26 = vst.msk [vmem:[#allocation2 + $0x18] sm:$0xff] %vm22_vm1, %v643_v57 }
   0x5   :  { %v478_v13 = vld [vmem:[%s954_s0 + $0x18] sm:$0xf0]  ;;  %v592_v15 = vld [vmem:[%s953_s1 + $0x10] sm:$0xff]  ;;  %v586_v17 = vld [vmem:[%s954_s0 + $0x64] sm:$0xf]  ;;  %27 = vst.msk [vmem:[#allocation2 + $0x20] sm:$0xff] %vm22_vm1, %v643_v57 }
   0x6   :  { %566 = vmatmul.msk.bf16.vlgmr.msra.gmra.mxu1 %vm215_vm0, %v473_v4  ;;  %241 = vmatpush.bf16.msra.mxu0 %v596_v5  ;;  %v481_v14 = vor.u32 %v576_v12, %v478_v13  ;;  %v518_v18 = vld [vmem:[%s954_s0 + $0x68] sm:$0xf0]  ;;  %v590_v20 = vld [vmem:[%s953_s1] sm:$0xff]  ;;  %v575_v22 = vld [vmem:[%s954_s0 + $0x4] sm:$0xf0]  ;;  %28 = vst.msk [vmem:[#allocation2 + $0x28] sm:$0xff] %vm22_vm1, %v643_v57 }
   0x7   :  { %600 = vmatpush.bf16.msra.mxu2 %v596_v5  ;;  %571 = vmatmul.msk.bf16.vlgmr.msra.gmra.mxu3 %vm215_vm0, %v513_v9  ;;  %v521_v19 = vor.u32 %v586_v17, %v518_v18  ;;  %v468_v21 = vld [vmem:[%s954_s0] sm:$0xf]  ;;  %v583_v24 = vld [vmem:[%s954_s0 + $0x44] sm:$0xf0]  ;;  %v578_v27 = vld [vmem:[%s954_s0 + $0x24] sm:$0xf] }
   0x8   :  { %v500_v23 = vld [vmem:[%s954_s0 + $0x40] sm:$0xf]  ;;  %v469_v25 = vor.u32 %v575_v22, %v468_v21  ;;  %v486_v28 = vld [vmem:[%s954_s0 + $0x28] sm:$0xf0]  ;;  %v588_v30 = vld [vmem:[%s954_s0 + $0x74] sm:$0xf] }
   0x9   :  { %v501_v26 = vor.u32 %v583_v24, %v500_v23  ;;  %v489_v29 = vor.u32 %v578_v27, %v486_v28  ;;  %v526_v31 = vld [vmem:[%s954_s0 + $0x78] sm:$0xf0]  ;;  %v476_v33 = vld [vmem:[%s954_s0 + $0x10] sm:$0xf]  ;;  %v577_v34 = vld [vmem:[%s954_s0 + $0x14] sm:$0xf0] }
   0xa   :  { %242 = vmatpush.bf16.msra.mxu0 %v595_v6  ;;  %v529_v32 = vor.u32 %v588_v30, %v526_v31  ;;  %v508_v35 = vld [vmem:[%s954_s0 + $0x50] sm:$0xf]  ;;  %v585_v36 = vld [vmem:[%s954_s0 + $0x54] sm:$0xf0]  ;;  %v477_v37 = vor.u32 %v577_v34, %v476_v33  ;;  %v580_v39 = vld [vmem:[%s954_s0 + $0x34] sm:$0xf] }
   0xb   :  { %601 = vmatpush.bf16.msra.mxu2 %v595_v6  ;;  %v509_v38 = vor.u32 %v585_v36, %v508_v35  ;;  %v494_v40 = vld [vmem:[%s954_s0 + $0x38] sm:$0xf0]  ;;  %v484_v42 = vld [vmem:[%s954_s0 + $0x20] sm:$0xf]  ;;  %v579_v43 = vld [vmem:[%s954_s0 + $0x24] sm:$0xf0] }
   0xc   :  { %v497_v41 = vor.u32 %v580_v39, %v494_v40  ;;  %v516_v44 = vld [vmem:[%s954_s0 + $0x60] sm:$0xf]  ;;  %v587_v45 = vld [vmem:[%s954_s0 + $0x64] sm:$0xf0]  ;;  %v485_v46 = vor.u32 %v579_v43, %v484_v42  ;;  %v582_v48 = vld [vmem:[%s954_s0 + $0x44] sm:$0xf] }
   0xd   :  { %v517_v47 = vor.u32 %v587_v45, %v516_v44  ;;  %v502_v49 = vld [vmem:[%s954_s0 + $0x48] sm:$0xf0]  ;;  %v492_v51 = vld [vmem:[%s954_s0 + $0x30] sm:$0xf]  ;;  %v581_v52 = vld [vmem:[%s954_s0 + $0x34] sm:$0xf0] }
   0xe   :  { %243 = vmatpush.bf16.msra.mxu0 %v594_v10  ;;  %v505_v50 = vor.u32 %v582_v48, %v502_v49  ;;  %v524_v53 = vld [vmem:[%s954_s0 + $0x70] sm:$0xf]  ;;  %v589_v54 = vld [vmem:[%s954_s0 + $0x74] sm:$0xf0]  ;;  %v493_v55 = vor.u32 %v581_v52, %v492_v51  ;;  %29 = vst.msk [vmem:[#allocation2 + $0x30] sm:$0xff] %vm22_vm1, %v643_v57  ;;  %v39_v62 = vld [vmem:[#allocation2] sm:$0xff] }
   0xf   :  { %602 = vmatpush.bf16.msra.mxu2 %v594_v10  ;;  %v525_v56 = vor.u32 %v589_v54, %v524_v53  ;;  %30 = vst.msk [vmem:[#allocation2 + $0x38] sm:$0xff] %vm22_vm1, %v643_v57  ;;  %v40_v4 = vld [vmem:[#allocation2 + $0x8] sm:$0xff]  ;;  %v822_v6 = vld [vmem:[%s955_s2] ss:$0 sm:$0xff] }
  0x10   :  { %31 = vst.msk [vmem:[#allocation2 + $0x40] sm:$0xff] %vm22_vm1, %v643_v57  ;;  %v827_v8 = vld [vmem:[%s956_s3] ss:$0 sm:$0xff] }
  0x11   :  { %32 = vst.msk [vmem:[#allocation2 + $0x48] sm:$0xff] %vm22_vm1, %v643_v57  ;;  %v43_v42 = vld [vmem:[#allocation2 + $0x20] sm:$0xff] }
  0x12   :  { %244 = vmatpush.bf16.msra.mxu0 %v593_v11  ;;  %33 = vst.msk [vmem:[#allocation2 + $0x50] sm:$0xff] %vm22_vm1, %v643_v57 }
  0x13   :  { %603 = vmatpush.bf16.msra.mxu2 %v593_v11  ;;  %34 = vst.msk [vmem:[#allocation2 + $0x58] sm:$0xff] %vm22_vm1, %v643_v57 }
  0x14   :  { %35 = vst.msk [vmem:[#allocation2 + $0x60] sm:$0xff] %vm22_vm1, %v643_v57 }
  0x15   :  { %36 = vst.msk [vmem:[#allocation2 + $0x68] sm:$0xff] %vm22_vm1, %v643_v57 }
  0x16   :  { %567 = vmatmul.msk.bf16.gmra.mxu1 %vm215_vm0, %v481_v14  ;;  %245 = vmatpush.bf16.msra.mxu0 %v592_v15  ;;  %37 = vst.msk [vmem:[#allocation2 + $0x70] sm:$0xff] %vm22_vm1, %v643_v57 }
  0x17   :  { %604 = vmatpush.bf16.msra.mxu2 %v592_v15  ;;  %572 = vmatmul.msk.bf16.gmra.mxu3 %vm215_vm0, %v521_v19  ;;  %38 = vst.msk [vmem:[#allocation2 + $0x78] sm:$0xff] %vm22_vm1, %v643_v57  ;;  %v47_v52 = vld [vmem:[#allocation2 + $0x40] sm:$0xff] }
  0x1a   :  { %246 = vmatpush.bf16.msra.mxu0 %v591_v16  ;;  %v50_v39 = vld [vmem:[#allocation2 + $0x58] sm:$0xff] }
  0x1b   :  { %605 = vmatpush.bf16.msra.mxu2 %v591_v16  ;;  %v41_v16 = vld [vmem:[#allocation2 + $0x10] sm:$0xff] }
  0x1e   :  { %247 = vmatpush.bf16.msra.mxu0 %v590_v20 }
  0x1f   :  { %606 = vmatpush.bf16.msra.mxu2 %v590_v20 }
  0x21   :  { %248 = vmatmul.bf16.vlgmr.msra.gmra.mxu0 %v469_v25  ;;  %v49_v25 = vld [vmem:[#allocation2 + $0x50] sm:$0xff] }
  0x22   :  { %268 = vmatmul.bf16.vlgmr.msra.gmra.mxu2 %v501_v26 }
  0x26   :  { %568 = vmatmul.msk.bf16.gmra.mxu1 %vm215_vm0, %v489_v29  ;;  %v42_v29 = vld [vmem:[#allocation2 + $0x18] sm:$0xff] }
  0x27   :  { %573 = vmatmul.msk.bf16.gmra.mxu3 %vm215_vm0, %v529_v32 }
  0x31   :  { %253 = vmatmul.bf16.gmra.mxu0 %v477_v37 }
  0x32   :  { %273 = vmatmul.bf16.gmra.mxu2 %v509_v38 }
  0x36   :  { %569 = vmatmul.msk.bf16.gmra.mxu1 %vm215_vm0, %v497_v41 }
  0x41   :  { %258 = vmatmul.bf16.gmra.mxu0 %v485_v46 }
  0x42   :  { %278 = vmatmul.bf16.gmra.mxu2 %v517_v47 }
  0x46   :  { %570 = vmatmul.msk.bf16.gmra.mxu1 %vm215_vm0, %v505_v50 }
  0x51   :  { %263 = vmatmul.bf16.gmra.mxu0 %v493_v55 }
  0x52   :  { %283 = vmatmul.bf16.gmra.mxu2 %v525_v56 }
  0x83   :  { %v298_v58 = vpop.f32.mrf.mxu1 }
  0x8a   :  { %v323_v13 = vpop.f32.mrf.mxu3 }
  0x8b   :  { %v300_v59 = vpop.f32.mrf.mxu1 }
  0x92   :  { %v325_v27 = vpop.f32.mrf.mxu3 }
  0x93   :  { %v303_v60 = vpop.f32.mrf.mxu1 }
  0x9a   :  { %v328_v44 = vpop.f32.mrf.mxu3 }
  0x9b   :  { %v305_v61 = vpop.f32.mrf.mxu1 }
  0x9e   :  { %v249_v63 = vpop.f32.mrf.mxu0 }
  0x9f   :  { %v299_v0 = vadd.f32 %v298_v58, %v249_v63  ;;  %v51_v58 = vld [vmem:[#allocation2 + $0x60] sm:$0xff] }
  0xa1   :  { %v338_v1 = vadd.f32 %v299_v0, %v39_v62  ;;  %v44_v62 = vld [vmem:[#allocation2 + $0x28] sm:$0xff] }
  0xa3   :  { %355 = vst.msk [vmem:[#allocation2] sm:$0xff] %vm22_vm1, %v338_v1  ;;  %v308_v2 = vpop.f32.mrf.mxu1 }
  0xa5   :  { %v817_v3 = vpop.f32.mrf.mxu2 }
  0xa6   :  { %v251_v5 = vpop.f32.mrf.mxu0 }
  0xa7   :  { %v301_v7 = vadd.f32 %v300_v59, %v251_v5 }
  0xa9   :  { %v339_v9 = vadd.f32 %v301_v7, %v40_v4 }
  0xaa   :  { %v374_v10 = vld [vmem:[#allocation2] sm:$0xff] }
  0xab   :  { %v394_v11 = vmul.f32 %v822_v6, %v374_v10  ;;  %356 = vst.msk [vmem:[#allocation2 + $0x8] sm:$0xff] %vm22_vm1, %v339_v9  ;;  %v831_v12 = vpop.f32.mrf.mxu1  ;;  %v48_v10 = vld [vmem:[#allocation2 + $0x48] sm:$0xff] }
  0xad   :  { %v414_v14 = vadd.f32 %v827_v8, %v394_v11  ;;  %v834_v15 = vpop.f32.mrf.mxu2 }
  0xae   :  { %v254_v17 = vpop.f32.mrf.mxu0 }
  0xaf   :  { %611 = vtanh.f32 %v414_v14  ;;  %v304_v18 = vadd.f32 %v303_v60, %v254_v17 }
  0xb1   :  { %v340_v19 = vadd.f32 %v304_v18, %v41_v16  ;;  %v52_v18 = vld [vmem:[#allocation2 + $0x68] sm:$0xff] }
  0xb2   :  { %v375_v20 = vld [vmem:[#allocation2 + $0x8] sm:$0xff] }
  0xb3   :  { %v395_v21 = vmul.f32 %v822_v6, %v375_v20  ;;  %357 = vst.msk [vmem:[#allocation2 + $0x10] sm:$0xff] %vm22_vm1, %v340_v19  ;;  %v838_v22 = vpop.f32.mrf.mxu1 }
  0xb5   :  { %v612_v23 = vpop.eup %611  ;;  %v415_v24 = vadd.f32 %v827_v8, %v395_v21  ;;  %v274_v26 = vpop.f32.mrf.mxu2 }
  0xb6   :  { %446 = vst.msk [vmem:[%s957_s4] sm:$0xff] %vm22_vm1, %v612_v23  ;;  %v324_v28 = vadd.f32 %v323_v13, %v274_v26  ;;  %v256_v30 = vpop.f32.mrf.mxu0  ;;  %v45_v23 = vld [vmem:[#allocation2 + $0x30] sm:$0xff] }
  0xb7   :  { %613 = vtanh.f32 %v415_v24  ;;  %v306_v31 = vadd.f32 %v305_v61, %v256_v30 }
  0xb8   :  { %v348_v32 = vadd.f32 %v324_v28, %v49_v25 }
  0xb9   :  { %v341_v33 = vadd.f32 %v306_v31, %v42_v29 }
  0xba   :  { %v376_v34 = vld [vmem:[#allocation2 + $0x10] sm:$0xff]  ;;  %365 = vst.msk [vmem:[#allocation2 + $0x50] sm:$0xff] %vm22_vm1, %v348_v32 }
  0xbb   :  { %v396_v35 = vmul.f32 %v822_v6, %v376_v34  ;;  %358 = vst.msk [vmem:[#allocation2 + $0x18] sm:$0xff] %vm22_vm1, %v341_v33  ;;  %v848_v36 = vpop.f32.mrf.mxu1 }
  0xbd   :  { %v614_v37 = vpop.eup %613  ;;  %v416_v38 = vadd.f32 %v827_v8, %v396_v35  ;;  %v276_v40 = vpop.f32.mrf.mxu2 }
  0xbe   :  { %447 = vst.msk [vmem:[%s957_s4 + $0x8] sm:$0xff] %vm22_vm1, %v614_v37  ;;  %v326_v41 = vadd.f32 %v325_v27, %v276_v40  ;;  %v259_v43 = vpop.f32.mrf.mxu0 }
  0xbf   :  { %615 = vtanh.f32 %v416_v38  ;;  %v309_v45 = vadd.f32 %v308_v2, %v259_v43 }
  0xc0   :  { %v349_v46 = vadd.f32 %v326_v41, %v50_v39  ;;  %v53_v39 = vld [vmem:[#allocation2 + $0x70] sm:$0xff] }
  0xc1   :  { %v384_v47 = vld [vmem:[#allocation2 + $0x50] sm:$0xff]  ;;  %v342_v48 = vadd.f32 %v309_v45, %v43_v42  ;;  %v46_v42 = vld [vmem:[#allocation2 + $0x38] sm:$0xff] }
  0xc2   :  { %v404_v49 = vmul.f32 %v822_v6, %v384_v47  ;;  %v377_v50 = vld [vmem:[#allocation2 + $0x18] sm:$0xff]  ;;  %366 = vst.msk [vmem:[#allocation2 + $0x58] sm:$0xff] %vm22_vm1, %v349_v46 }
  0xc3   :  { %v397_v51 = vmul.f32 %v822_v6, %v377_v50  ;;  %359 = vst.msk [vmem:[#allocation2 + $0x20] sm:$0xff] %vm22_vm1, %v342_v48  ;;  %v318_v53 = vpop.f32.mrf.mxu1 }
  0xc4   :  { %v424_v54 = vadd.f32 %v827_v8, %v404_v49  ;;  %v319_v55 = vadd.f32 %v318_v53, %v817_v3  ;;  %v330_v3 = vpop.f32.mrf.mxu3 }
  0xc5   :  { %v616_v56 = vpop.eup %615  ;;  %v417_v57 = vadd.f32 %v827_v8, %v397_v51  ;;  %v279_v59 = vpop.f32.mrf.mxu2 }
  0xc6   :  { %448 = vst.msk [vmem:[%s957_s4 + $0x10] sm:$0xff] %vm22_vm1, %v616_v56  ;;  %617 = vtanh.f32 %v424_v54  ;;  %v346_v60 = vadd.f32 %v319_v55, %v47_v52  ;;  %v329_v61 = vadd.f32 %v328_v44, %v279_v59  ;;  %v261_v63 = vpop.f32.mrf.mxu0  ;;  %v54_v59 = vld [vmem:[#allocation2 + $0x78] sm:$0xff] }
  0xc7   :  { %619 = vtanh.f32 %v417_v57  ;;  %v311_v0 = vadd.f32 %v831_v12, %v261_v63 }
  0xc8   :  { %363 = vst.msk [vmem:[#allocation2 + $0x40] sm:$0xff] %vm22_vm1, %v346_v60  ;;  %v350_v1 = vadd.f32 %v329_v61, %v51_v58 }
  0xc9   :  { %v385_v2 = vld [vmem:[#allocation2 + $0x58] sm:$0xff]  ;;  %v343_v4 = vadd.f32 %v311_v0, %v44_v62 }
  0xca   :  { %v405_v5 = vmul.f32 %v822_v6, %v385_v2  ;;  %v378_v7 = vld [vmem:[#allocation2 + $0x20] sm:$0xff]  ;;  %367 = vst.msk [vmem:[#allocation2 + $0x60] sm:$0xff] %vm22_vm1, %v350_v1 }
  0xcb   :  { %v398_v9 = vmul.f32 %v822_v6, %v378_v7  ;;  %360 = vst.msk [vmem:[#allocation2 + $0x28] sm:$0xff] %vm22_vm1, %v343_v4  ;;  %v320_v11 = vpop.f32.mrf.mxu1 }
  0xcc   :  { %v618_v13 = vpop.eup %617  ;;  %v425_v12 = vadd.f32 %v827_v8, %v405_v5  ;;  %v321_v14 = vadd.f32 %v320_v11, %v834_v15  ;;  %v333_v34 = vpop.f32.mrf.mxu3 }
  0xcd   :  { %v620_v16 = vpop.eup %619  ;;  %456 = vst.msk [vmem:[%s957_s4 + $0x50] sm:$0xff] %vm22_vm1, %v618_v13  ;;  %v418_v17 = vadd.f32 %v827_v8, %v398_v9  ;;  %v281_v19 = vpop.f32.mrf.mxu2 }
  0xce   :  { %449 = vst.msk [vmem:[%s957_s4 + $0x18] sm:$0xff] %vm22_vm1, %v620_v16  ;;  %621 = vtanh.f32 %v425_v12  ;;  %v347_v20 = vadd.f32 %v321_v14, %v48_v10  ;;  %v331_v21 = vadd.f32 %v330_v3, %v281_v19  ;;  %v264_v15 = vpop.f32.mrf.mxu0 }
  0xcf   :  { %623 = vtanh.f32 %v418_v17  ;;  %v382_v24 = vld [vmem:[#allocation2 + $0x40] sm:$0xff]  ;;  %v314_v25 = vadd.f32 %v838_v22, %v264_v15 }
  0xd0   :  { %v402_v26 = vmul.f32 %v822_v6, %v382_v24  ;;  %364 = vst.msk [vmem:[#allocation2 + $0x48] sm:$0xff] %vm22_vm1, %v347_v20  ;;  %v351_v27 = vadd.f32 %v331_v21, %v52_v18 }
  0xd1   :  { %v386_v28 = vld [vmem:[#allocation2 + $0x60] sm:$0xff]  ;;  %v344_v29 = vadd.f32 %v314_v25, %v45_v23 }
  0xd2   :  { %v422_v30 = vadd.f32 %v827_v8, %v402_v26  ;;  %v406_v31 = vmul.f32 %v822_v6, %v386_v28  ;;  %v379_v32 = vld [vmem:[#allocation2 + $0x28] sm:$0xff]  ;;  %368 = vst.msk [vmem:[#allocation2 + $0x68] sm:$0xff] %vm22_vm1, %v351_v27 }
  0xd3   :  { %v399_v33 = vmul.f32 %v822_v6, %v379_v32  ;;  %361 = vst.msk [vmem:[#allocation2 + $0x30] sm:$0xff] %vm22_vm1, %v344_v29 }
  0xd4   :  { %v622_v22 = vpop.eup %621  ;;  %625 = vtanh.f32 %v422_v30  ;;  %v426_v35 = vadd.f32 %v827_v8, %v406_v31  ;;  %v335_v58 = vpop.f32.mrf.mxu3 }
  0xd5   :  { %v624_v37 = vpop.eup %623  ;;  %457 = vst.msk [vmem:[%s957_s4 + $0x58] sm:$0xff] %vm22_vm1, %v622_v22  ;;  %v419_v38 = vadd.f32 %v827_v8, %v399_v33  ;;  %v284_v40 = vpop.f32.mrf.mxu2 }
  0xd6   :  { %450 = vst.msk [vmem:[%s957_s4 + $0x20] sm:$0xff] %vm22_vm1, %v624_v37  ;;  %627 = vtanh.f32 %v426_v35  ;;  %v334_v41 = vadd.f32 %v333_v34, %v284_v40  ;;  %v266_v43 = vpop.f32.mrf.mxu0 }
  0xd7   :  { %629 = vtanh.f32 %v419_v38  ;;  %v383_v44 = vld [vmem:[#allocation2 + $0x48] sm:$0xff]  ;;  %v316_v45 = vadd.f32 %v848_v36, %v266_v43 }
  0xd8   :  { %v403_v46 = vmul.f32 %v822_v6, %v383_v44  ;;  %v352_v47 = vadd.f32 %v334_v41, %v53_v39 }
  0xd9   :  { %v387_v48 = vld [vmem:[#allocation2 + $0x68] sm:$0xff]  ;;  %v345_v49 = vadd.f32 %v316_v45, %v46_v42 }
  0xda   :  { %v626_v50 = vpop.eup %625  ;;  %v423_v51 = vadd.f32 %v827_v8, %v403_v46  ;;  %v407_v52 = vmul.f32 %v822_v6, %v387_v48  ;;  %v380_v53 = vld [vmem:[#allocation2 + $0x30] sm:$0xff]  ;;  %369 = vst.msk [vmem:[#allocation2 + $0x70] sm:$0xff] %vm22_vm1, %v352_v47 }
  0xdb   :  { %454 = vst.msk [vmem:[%s957_s4 + $0x40] sm:$0xff] %vm22_vm1, %v626_v50  ;;  %v400_v36 = vmul.f32 %v822_v6, %v380_v53 }
  0xdc   :  { %v628_v54 = vpop.eup %627  ;;  %631 = vtanh.f32 %v423_v51  ;;  %v427_v55 = vadd.f32 %v827_v8, %v407_v52  ;;  %362 = vst.msk [vmem:[#allocation2 + $0x38] sm:$0xff] %vm22_vm1, %v345_v49 }
  0xdd   :  { %v630_v56 = vpop.eup %629  ;;  %458 = vst.msk [vmem:[%s957_s4 + $0x60] sm:$0xff] %vm22_vm1, %v628_v54  ;;  %v420_v57 = vadd.f32 %v827_v8, %v400_v36  ;;  %v286_v60 = vpop.f32.mrf.mxu2 }
  0xde   :  { %451 = vst.msk [vmem:[%s957_s4 + $0x28] sm:$0xff] %vm22_vm1, %v630_v56  ;;  %633 = vtanh.f32 %v427_v55  ;;  %v336_v61 = vadd.f32 %v335_v58, %v286_v60 }
  0xdf   :  { %635 = vtanh.f32 %v420_v57 }
  0xe0   :  { %v353_v62 = vadd.f32 %v336_v61, %v54_v59 }
  0xe1   :  { %v388_v63 = vld [vmem:[#allocation2 + $0x70] sm:$0xff] }
  0xe2   :  { %v632_v0 = vpop.eup %631  ;;  %v408_v1 = vmul.f32 %v822_v6, %v388_v63  ;;  %370 = vst.msk [vmem:[#allocation2 + $0x78] sm:$0xff] %vm22_vm1, %v353_v62 }
  0xe3   :  { %455 = vst.msk [vmem:[%s957_s4 + $0x48] sm:$0xff] %vm22_vm1, %v632_v0  ;;  %v381_v2 = vld [vmem:[#allocation2 + $0x38] sm:$0xff] }
  0xe4   :  { %v634_v3 = vpop.eup %633  ;;  %v428_v4 = vadd.f32 %v827_v8, %v408_v1  ;;  %v401_v5 = vmul.f32 %v822_v6, %v381_v2 }
  0xe5   :  { %v636_v7 = vpop.eup %635  ;;  %459 = vst.msk [vmem:[%s957_s4 + $0x68] sm:$0xff] %vm22_vm1, %v634_v3 }
  0xe6   :  { %452 = vst.msk [vmem:[%s957_s4 + $0x30] sm:$0xff] %vm22_vm1, %v636_v7  ;;  %637 = vtanh.f32 %v428_v4  ;;  %v421_v9 = vadd.f32 %v827_v8, %v401_v5 }
  0xe8   :  { %639 = vtanh.f32 %v421_v9 }
  0xe9   :  { %v389_v10 = vld [vmem:[#allocation2 + $0x78] sm:$0xff] }
  0xea   :  { %v409_v11 = vmul.f32 %v822_v6, %v389_v10 }
  0xec   :  { %v638_v13 = vpop.eup %637  ;;  %v429_v12 = vadd.f32 %v827_v8, %v409_v11 }
  0xed   :  { %460 = vst.msk [vmem:[%s957_s4 + $0x70] sm:$0xff] %vm22_vm1, %v638_v13 }
  0xee   :  { %v640_v14 = vpop.eup %639  ;;  %641 = vtanh.f32 %v429_v12 }
  0xef   :  { %453 = vst.msk [vmem:[%s957_s4 + $0x38] sm:$0xff] %vm22_vm1, %v640_v14 }
  0xf4   :  { %v642_v16 = vpop.eup %641 }
  0xf5   :  { %461 = vst.msk [vmem:[%s957_s4 + $0x78] sm:$0xff] %vm22_vm1, %v642_v16 }

</bundles_post_ra>
